<compile_context>
chip_gen: v6e
topology: v6e:2x2x1
jax: 0.10.0
libtpu: 0.0.40
codegen_flags: <defaults>
</compile_context>

<pallas_src>
import jax
import jax.numpy as jnp
from jax.experimental import pallas as pl
from jax.experimental.pallas import tpu as pltpu

# ---- hyper-parameters (small shapes consistent with the module) ----
N = 2                 # batch
IN_CH = 4             # in_channels
OUT_CH = 8            # out_channels
BOT = 32              # bottleneck_channels (module default)
KS = (9, 19, 39)      # kernel_sizes (module default)
L = 16                # sequence length
KMAX = max(KS)        # 39
PMAX = KMAX // 2      # 19, "same" padding of the widest branch
EPS = 1e-5            # BatchNorm1d eps
N_CONV = len(KS) * OUT_CH          # 24 conv-branch channels
C_CAT = N_CONV + OUT_CH            # 32 concatenated channels
C_PAD = 128                        # lane-dense padded output channels

# im2col geometry (bottleneck folded into tap weights => IN_CH columns/tap)
K_X = KMAX * IN_CH                 # 156 columns from the conv branches
K_TOT = K_X + IN_CH                # 160: + maxpool(x) columns

# zero-padded per-batch x buffer: leading pad rounded up to a sublane tile
LEAD = 24                          # >= PMAX, multiple of 8 -> aligned writes
XPAD_ROWS = 64                     # >= LEAD + L + PMAX (=59), multiple of 8
BASE = LEAD - PMAX                 # 5: padded row read by tap 0 at position 0

# Matmul operand dtype.  jnp.bfloat16 halves the im2col/weight bytes and feeds
# the MXU's native path on v6e/v7x (accumulation stays f32), but requires the
# correctness tolerance to be loosened to ~1e-2; keep f32 for the 1e-4 check.
MM_DTYPE = jnp.float32


def inception_kernel(x_ref, w_ref, b_ref, out_ref, xpad_ref):
    # x_ref: (N*L, IN_CH), rows ordered (batch, length)
    # w_ref: (K_TOT, C_PAD) combined im2col weight, BN scale folded in
    # b_ref: (N*L, C_PAD) per-row bias (branch biases + positional bottleneck
    #        bias + BN shift folded in)
    blocks = []
    # NOTE: N is tiny here.  If batch*length grows, move rows onto a
    # "parallel" grid axis (256-512 row blocks) instead of unrolling this loop.
    for n in range(N):
        xb = x_ref[n * L:(n + 1) * L, :]                  # (L, IN_CH)

        # Zero-padded per-batch buffer: only the pad strips are zero-filled,
        # and all three stores start at sublane-aligned (multiple-of-8) rows.
        xpad_ref[n, 0:LEAD, :] = jnp.zeros((LEAD, IN_CH), jnp.float32)
        xpad_ref[n, LEAD:LEAD + L, :] = xb
        xpad_ref[n, LEAD + L:XPAD_ROWS, :] = jnp.zeros(
            (XPAD_ROWS - LEAD - L, IN_CH), jnp.float32)

        # 39 shifted windows (IN_CH lanes per tap) of the padded sequence.
        wins = [xpad_ref[n, BASE + t:BASE + t + L, :] for t in range(KMAX)]

        # maxpool(k=3, stride=1, pad=1): neighbours read from the same buffer,
        # with the zero-pad rows replaced by the edge value (max(a, a) == a,
        # identical to -inf padding).
        dn = xpad_ref[n, LEAD - 1:LEAD - 1 + L, :]        # x[l-1]
        up = xpad_ref[n, LEAD + 1:LEAD + 1 + L, :]        # x[l+1]
        row = jax.lax.broadcasted_iota(jnp.int32, (L, IN_CH), 0)
        mp = jnp.maximum(xb, jnp.maximum(jnp.where(row > 0, dn, xb),
                                         jnp.where(row < L - 1, up, xb)))

        # im2col row block for this batch as ONE register value: no staging
        # scratch round-trip and no narrow masked column stores (the lane
        # concatenation rides the XLU slot, not the store slot).
        blocks.append(jnp.concatenate(wins + [mp], axis=-1))   # (L, K_TOT)

    col = jnp.concatenate(blocks, axis=0)                 # (N*L, K_TOT)

    # ONE fused matmul: bottleneck + all three conv branches + maxpool-branch
    # 1x1 conv, with eval-mode BatchNorm pre-folded; ReLU; a single lane-dense
    # store of the (N*L, 128) padded output.
    y = jnp.dot(col.astype(MM_DTYPE), w_ref[...],
                preferred_element_type=jnp.float32) + b_ref[...]
    out_ref[...] = jnp.maximum(y, 0.0)


def fold_params(p):
    """One-time parameter transform: fold the 1x1 bottleneck into every branch
    tap, center-align the three kernels on 39 taps, fold eval-mode BatchNorm
    into the combined weight, and build a per-row (position-dependent) bias."""
    scale = p['gamma'] * jax.lax.rsqrt(p['var'] + EPS)            # (1, C_CAT)

    # center-aligned 39-tap weights for the three branches: (KMAX, BOT, 24)
    w_taps = jnp.zeros((KMAX, BOT, N_CONV), jnp.float32)
    for i, k in enumerate(KS):
        off = PMAX - k // 2
        w_taps = w_taps.at[off:off + k, :,
                           i * OUT_CH:(i + 1) * OUT_CH].set(p['ws'][i])

    # fold the bottleneck weight into every tap: (KMAX, IN_CH, 24)
    w_x = jnp.einsum('cb,tbo->tco', p['wb'], w_taps)

    w_comb = jnp.zeros((K_TOT, C_CAT), jnp.float32)
    w_comb = w_comb.at[:K_X, :N_CONV].set(w_x.reshape(K_X, N_CONV))
    w_comb = w_comb.at[K_X:K_TOT, N_CONV:].set(p['wm'])           # maxpool 1x1

    # bottleneck bias contributes only at taps whose window lies inside the
    # sequence -> a position-dependent additive bias, computed at fold time.
    bb_tap = jnp.einsum('b,tbo->to', p['bb'][0], w_taps)          # (KMAX, 24)
    l_idx = jnp.arange(L)[:, None]
    t_idx = jnp.arange(KMAX)[None, :]
    pos = l_idx + t_idx - PMAX
    valid = ((pos >= 0) & (pos < L)).astype(jnp.float32)          # (L, KMAX)
    b_extra = valid @ bb_tap                                       # (L, 24)

    bs_cat = jnp.concatenate([p['bs'][0], p['bs'][1], p['bs'][2]], -1)  # (1,24)
    b_conv = b_extra + bs_cat                                      # (L, 24)
    b_mp = jnp.broadcast_to(p['bm'], (L, OUT_CH))                  # (L, 8)
    b_pre = jnp.concatenate([b_conv, b_mp], axis=-1)               # (L, C_CAT)

    # fold eval-mode BatchNorm into weight (scale) and bias (shift)
    w_f = w_comb * scale
    b_f = (b_pre - p['mean']) * scale + p['beta']                  # (L, C_CAT)

    # tile the per-position bias over batch rows; pad channels to 128 lanes
    b_rows = jnp.tile(b_f, (N, 1))                                 # (N*L, C_CAT)
    w_pad = jnp.zeros((K_TOT, C_PAD), jnp.float32).at[:, :C_CAT].set(w_f)
    b_pad = jnp.zeros((N * L, C_PAD), jnp.float32).at[:, :C_CAT].set(b_rows)

    return {'w': w_pad.astype(MM_DTYPE), 'b': b_pad}


def inception_forward(x_ncl, f):
    """x_ncl: (N, IN_CH, L) float32 PyTorch layout; f: folded params.
    Returns (N, C_CAT, L)."""
    x_nlc = jnp.transpose(x_ncl, (0, 2, 1)).astype(jnp.float32)    # (N, L, IN_CH)
    x_flat = x_nlc.reshape(N * L, IN_CH)

    def full_spec(shape):
        nd = len(shape)
        return pl.BlockSpec(shape, lambda i, _nd=nd: (0,) * _nd)

    out_flat = pl.pallas_call(
        inception_kernel,
        out_shape=jax.ShapeDtypeStruct((N * L, C_PAD), jnp.float32),
        grid_spec=pltpu.PrefetchScalarGridSpec(
            num_scalar_prefetch=0,
            grid=(1,),
            in_specs=[
                full_spec((N * L, IN_CH)),
                full_spec((K_TOT, C_PAD)),
                full_spec((N * L, C_PAD)),
            ],
            out_specs=full_spec((N * L, C_PAD)),
            scratch_shapes=[
                pltpu.VMEM((N, XPAD_ROWS, IN_CH), jnp.float32),    # padded x
            ],
        ),
        compiler_params=pltpu.CompilerParams(
            dimension_semantics=("arbitrary",)),
    )(x_flat, f['w'], f['b'])

    out_nlc = out_flat[:, :C_CAT].reshape(N, L, C_CAT)             # drop lane pad
    return jnp.transpose(out_nlc, (0, 2, 1))                       # (N, C_CAT, L)


def init_params(key):
    ks = jax.random.split(key, 16)
    p = {
        # bottleneck Conv1d(IN_CH, BOT, 1): weight stored as (C_in, C_out)
        'wb': 0.1 * jax.random.normal(ks[0], (IN_CH, BOT), jnp.float32),
        'bb': 0.1 * jax.random.normal(ks[1], (1, BOT), jnp.float32),
        # wide convs Conv1d(BOT, OUT_CH, k): weight stored as (k, C_in, C_out)
        'ws': [0.05 * jax.random.normal(ks[2 + i], (k, BOT, OUT_CH), jnp.float32)
               for i, k in enumerate(KS)],
        'bs': [0.1 * jax.random.normal(ks[5 + i], (1, OUT_CH), jnp.float32)
               for i in range(len(KS))],
        # maxpool-branch Conv1d(IN_CH, OUT_CH, 1)
        'wm': 0.1 * jax.random.normal(ks[8], (IN_CH, OUT_CH), jnp.float32),
        'bm': 0.1 * jax.random.normal(ks[9], (1, OUT_CH), jnp.float32),
        # BatchNorm1d(C_CAT) parameters + running stats
        'gamma': 1.0 + 0.1 * jax.random.normal(ks[10], (1, C_CAT), jnp.float32),
        'beta': 0.1 * jax.random.normal(ks[11], (1, C_CAT), jnp.float32),
        'mean': 0.1 * jax.random.normal(ks[12], (1, C_CAT), jnp.float32),
        'var': 1.0 + jnp.abs(0.1 * jax.random.normal(ks[13], (1, C_CAT), jnp.float32)),
    }
    return p


def reference_forward(x_ncl, p):
    """Pure-jnp reference (unfused math, raw params) for a correctness check."""
    x = jnp.transpose(x_ncl, (0, 2, 1))                            # (N, L, IN_CH)
    b = jnp.einsum('nlc,cd->nld', x, p['wb']) + p['bb']            # bottleneck
    bpad = jnp.pad(b, ((0, 0), (PMAX, PMAX), (0, 0)))
    outs = []
    for i, k in enumerate(KS):
        pad = k // 2
        acc = jnp.zeros((N, L, OUT_CH), jnp.float32)
        for t in range(k):
            s = PMAX - pad + t
            acc = acc + jnp.einsum('nlc,co->nlo', bpad[:, s:s + L, :], p['ws'][i][t])
        outs.append(acc + p['bs'][i])
    xp = jnp.pad(x, ((0, 0), (1, 1), (0, 0)), constant_values=-jnp.inf)
    mp = jnp.maximum(jnp.maximum(xp[:, 0:L], xp[:, 1:L + 1]), xp[:, 2:L + 2])
    outs.append(jnp.einsum('nlc,co->nlo', mp, p['wm']) + p['bm'])
    y = jnp.concatenate(outs, axis=-1)
    y = (y - p['mean']) * jax.lax.rsqrt(p['var'] + EPS) * p['gamma'] + p['beta']
    y = jnp.maximum(y, 0.0)
    return jnp.transpose(y, (0, 2, 1))


if __name__ == "__main__":
    key = jax.random.PRNGKey(0)
    kx, kp = jax.random.split(key)
    x = jax.random.normal(kx, (N, IN_CH, L), jnp.float32)          # PyTorch NCL input
    params = init_params(kp)
    folded = fold_params(params)                                   # one-time transform

    out = inception_forward(x, folded)
    out = jax.block_until_ready(out)

    ref = reference_forward(x, params)
    assert out.shape == (N, C_CAT, L), out.shape
    assert jnp.allclose(out, ref, rtol=1e-4, atol=1e-4), \
        float(jnp.max(jnp.abs(out - ref)))

    print("KERNEL_OK")
</pallas_src>

<mosaic_0001>
module attributes {stable_mosaic.version = 11 : i64} {
  func.func @inception_kernel(%arg0: i32, %arg1: memref<32x4xf32, #tpu.memory_space<vmem>>, %arg2: memref<160x128xf32, #tpu.memory_space<vmem>>, %arg3: memref<32x128xf32, #tpu.memory_space<vmem>>, %arg4: memref<32x128xf32, #tpu.memory_space<vmem>>, %arg5: memref<2x64x4xf32, #tpu.memory_space<vmem>>) attributes {dimension_semantics = [#tpu.dimension_semantics<arbitrary>], iteration_bounds = array<i64: 1>, scalar_prefetch = 0 : i64, scratch_operands = 1 : i64, tpu.core_type = #tpu.core_type<tc>, window_params = [{pipeline_mode = #tpu.pipeline_mode<synchronous>, transform_indices = @transform_0, window_bounds = array<i64: 32, 4>}, {pipeline_mode = #tpu.pipeline_mode<synchronous>, transform_indices = @transform_1, window_bounds = array<i64: 160, 128>}, {pipeline_mode = #tpu.pipeline_mode<synchronous>, transform_indices = @transform_2, window_bounds = array<i64: 32, 128>}, {pipeline_mode = #tpu.pipeline_mode<synchronous>, transform_indices = @transform_3, window_bounds = array<i64: 32, 128>}]} {
    %c0 = arith.constant 0 : index
    %c0_0 = arith.constant 0 : index
    %0 = vector.load %arg1[%c0, %c0_0] : memref<32x4xf32, #tpu.memory_space<vmem>>, vector<16x4xf32>
    %cst = arith.constant 0.000000e+00 : f32
    %1 = vector.broadcast %cst : f32 to vector<24x4xf32>
    %c0_1 = arith.constant 0 : index
    %c0_2 = arith.constant 0 : index
    %c0_3 = arith.constant 0 : index
    %2 = vector.load %arg5[%c0_1, %c0_2, %c0_3] : memref<2x64x4xf32, #tpu.memory_space<vmem>>, vector<1x24x4xf32>
    %3 = vector.shape_cast %2 : vector<1x24x4xf32> to vector<24x4xf32>
    %4 = vector.shape_cast %1 : vector<24x4xf32> to vector<1x24x4xf32>
    tpu.vector_store %arg5[%c0_1, %c0_2, %c0_3], %4 {strides = array<i32>} : memref<2x64x4xf32, #tpu.memory_space<vmem>>, vector<1x24x4xf32>,
    %c0_4 = arith.constant 0 : index
    %c24 = arith.constant 24 : index
    %c0_5 = arith.constant 0 : index
    %5 = vector.load %arg5[%c0_4, %c24, %c0_5] : memref<2x64x4xf32, #tpu.memory_space<vmem>>, vector<1x16x4xf32>
    %6 = vector.shape_cast %5 : vector<1x16x4xf32> to vector<16x4xf32>
    %7 = vector.shape_cast %0 : vector<16x4xf32> to vector<1x16x4xf32>
    tpu.vector_store %arg5[%c0_4, %c24, %c0_5], %7 {strides = array<i32>} : memref<2x64x4xf32, #tpu.memory_space<vmem>>, vector<1x16x4xf32>,
    %cst_6 = arith.constant 0.000000e+00 : f32
    %8 = vector.broadcast %cst_6 : f32 to vector<24x4xf32>
    %c0_7 = arith.constant 0 : index
    %c40 = arith.constant 40 : index
    %c0_8 = arith.constant 0 : index
    %9 = vector.load %arg5[%c0_7, %c40, %c0_8] : memref<2x64x4xf32, #tpu.memory_space<vmem>>, vector<1x24x4xf32>
    %10 = vector.shape_cast %9 : vector<1x24x4xf32> to vector<24x4xf32>
    %11 = vector.shape_cast %8 : vector<24x4xf32> to vector<1x24x4xf32>
    tpu.vector_store %arg5[%c0_7, %c40, %c0_8], %11 {strides = array<i32>} : memref<2x64x4xf32, #tpu.memory_space<vmem>>, vector<1x24x4xf32>,
    %c0_9 = arith.constant 0 : index
    %c5 = arith.constant 5 : index
    %c0_10 = arith.constant 0 : index
    %12 = vector.load %arg5[%c0_9, %c5, %c0_10] : memref<2x64x4xf32, #tpu.memory_space<vmem>>, vector<1x16x4xf32>
    %13 = vector.shape_cast %12 : vector<1x16x4xf32> to vector<16x4xf32>
    %c0_11 = arith.constant 0 : index
    %c6 = arith.constant 6 : index
    %c0_12 = arith.constant 0 : index
    %14 = vector.load %arg5[%c0_11, %c6, %c0_12] : memref<2x64x4xf32, #tpu.memory_space<vmem>>, vector<1x16x4xf32>
    %15 = vector.shape_cast %14 : vector<1x16x4xf32> to vector<16x4xf32>
    %c0_13 = arith.constant 0 : index
    %c7 = arith.constant 7 : index
    %c0_14 = arith.constant 0 : index
    %16 = vector.load %arg5[%c0_13, %c7, %c0_14] : memref<2x64x4xf32, #tpu.memory_space<vmem>>, vector<1x16x4xf32>
    %17 = vector.shape_cast %16 : vector<1x16x4xf32> to vector<16x4xf32>
    %c0_15 = arith.constant 0 : index
    %c8 = arith.constant 8 : index
    %c0_16 = arith.constant 0 : index
    %18 = vector.load %arg5[%c0_15, %c8, %c0_16] : memref<2x64x4xf32, #tpu.memory_space<vmem>>, vector<1x16x4xf32>
    %19 = vector.shape_cast %18 : vector<1x16x4xf32> to vector<16x4xf32>
    %c0_17 = arith.constant 0 : index
    %c9 = arith.constant 9 : index
    %c0_18 = arith.constant 0 : index
    %20 = vector.load %arg5[%c0_17, %c9, %c0_18] : memref<2x64x4xf32, #tpu.memory_space<vmem>>, vector<1x16x4xf32>
    %21 = vector.shape_cast %20 : vector<1x16x4xf32> to vector<16x4xf32>
    %c0_19 = arith.constant 0 : index
    %c10 = arith.constant 10 : index
    %c0_20 = arith.constant 0 : index
    %22 = vector.load %arg5[%c0_19, %c10, %c0_20] : memref<2x64x4xf32, #tpu.memory_space<vmem>>, vector<1x16x4xf32>
    %23 = vector.shape_cast %22 : vector<1x16x4xf32> to vector<16x4xf32>
    %c0_21 = arith.constant 0 : index
    %c11 = arith.constant 11 : index
    %c0_22 = arith.constant 0 : index
    %24 = vector.load %arg5[%c0_21, %c11, %c0_22] : memref<2x64x4xf32, #tpu.memory_space<vmem>>, vector<1x16x4xf32>
    %25 = vector.shape_cast %24 : vector<1x16x4xf32> to vector<16x4xf32>
    %c0_23 = arith.constant 0 : index
    %c12 = arith.constant 12 : index
    %c0_24 = arith.constant 0 : index
    %26 = vector.load %arg5[%c0_23, %c12, %c0_24] : memref<2x64x4xf32, #tpu.memory_space<vmem>>, vector<1x16x4xf32>
    %27 = vector.shape_cast %26 : vector<1x16x4xf32> to vector<16x4xf32>
    %c0_25 = arith.constant 0 : index
    %c13 = arith.constant 13 : index
    %c0_26 = arith.constant 0 : index
    %28 = vector.load %arg5[%c0_25, %c13, %c0_26] : memref<2x64x4xf32, #tpu.memory_space<vmem>>, vector<1x16x4xf32>
    %29 = vector.shape_cast %28 : vector<1x16x4xf32> to vector<16x4xf32>
    %c0_27 = arith.constant 0 : index
    %c14 = arith.constant 14 : index
    %c0_28 = arith.constant 0 : index
    %30 = vector.load %arg5[%c0_27, %c14, %c0_28] : memref<2x64x4xf32, #tpu.memory_space<vmem>>, vector<1x16x4xf32>
    %31 = vector.shape_cast %30 : vector<1x16x4xf32> to vector<16x4xf32>
    %c0_29 = arith.constant 0 : index
    %c15 = arith.constant 15 : index
    %c0_30 = arith.constant 0 : index
    %32 = vector.load %arg5[%c0_29, %c15, %c0_30] : memref<2x64x4xf32, #tpu.memory_space<vmem>>, vector<1x16x4xf32>
    %33 = vector.shape_cast %32 : vector<1x16x4xf32> to vector<16x4xf32>
    %c0_31 = arith.constant 0 : index
    %c16 = arith.constant 16 : index
    %c0_32 = arith.constant 0 : index
    %34 = vector.load %arg5[%c0_31, %c16, %c0_32] : memref<2x64x4xf32, #tpu.memory_space<vmem>>, vector<1x16x4xf32>
    %35 = vector.shape_cast %34 : vector<1x16x4xf32> to vector<16x4xf32>
    %c0_33 = arith.constant 0 : index
    %c17 = arith.constant 17 : index
    %c0_34 = arith.constant 0 : index
    %36 = vector.load %arg5[%c0_33, %c17, %c0_34] : memref<2x64x4xf32, #tpu.memory_space<vmem>>, vector<1x16x4xf32>
    %37 = vector.shape_cast %36 : vector<1x16x4xf32> to vector<16x4xf32>
    %c0_35 = arith.constant 0 : index
    %c18 = arith.constant 18 : index
    %c0_36 = arith.constant 0 : index
    %38 = vector.load %arg5[%c0_35, %c18, %c0_36] : memref<2x64x4xf32, #tpu.memory_space<vmem>>, vector<1x16x4xf32>
    %39 = vector.shape_cast %38 : vector<1x16x4xf32> to vector<16x4xf32>
    %c0_37 = arith.constant 0 : index
    %c19 = arith.constant 19 : index
    %c0_38 = arith.constant 0 : index
    %40 = vector.load %arg5[%c0_37, %c19, %c0_38] : memref<2x64x4xf32, #tpu.memory_space<vmem>>, vector<1x16x4xf32>
    %41 = vector.shape_cast %40 : vector<1x16x4xf32> to vector<16x4xf32>
    %c0_39 = arith.constant 0 : index
    %c20 = arith.constant 20 : index
    %c0_40 = arith.constant 0 : index
    %42 = vector.load %arg5[%c0_39, %c20, %c0_40] : memref<2x64x4xf32, #tpu.memory_space<vmem>>, vector<1x16x4xf32>
    %43 = vector.shape_cast %42 : vector<1x16x4xf32> to vector<16x4xf32>
    %c0_41 = arith.constant 0 : index
    %c21 = arith.constant 21 : index
    %c0_42 = arith.constant 0 : index
    %44 = vector.load %arg5[%c0_41, %c21, %c0_42] : memref<2x64x4xf32, #tpu.memory_space<vmem>>, vector<1x16x4xf32>
    %45 = vector.shape_cast %44 : vector<1x16x4xf32> to vector<16x4xf32>
    %c0_43 = arith.constant 0 : index
    %c22 = arith.constant 22 : index
    %c0_44 = arith.constant 0 : index
    %46 = vector.load %arg5[%c0_43, %c22, %c0_44] : memref<2x64x4xf32, #tpu.memory_space<vmem>>, vector<1x16x4xf32>
    %47 = vector.shape_cast %46 : vector<1x16x4xf32> to vector<16x4xf32>
    %c0_45 = arith.constant 0 : index
    %c23 = arith.constant 23 : index
    %c0_46 = arith.constant 0 : index
    %48 = vector.load %arg5[%c0_45, %c23, %c0_46] : memref<2x64x4xf32, #tpu.memory_space<vmem>>, vector<1x16x4xf32>
    %49 = vector.shape_cast %48 : vector<1x16x4xf32> to vector<16x4xf32>
    %c0_47 = arith.constant 0 : index
    %c24_48 = arith.constant 24 : index
    %c0_49 = arith.constant 0 : index
    %50 = vector.load %arg5[%c0_47, %c24_48, %c0_49] : memref<2x64x4xf32, #tpu.memory_space<vmem>>, vector<1x16x4xf32>
    %51 = vector.shape_cast %50 : vector<1x16x4xf32> to vector<16x4xf32>
    %c0_50 = arith.constant 0 : index
    %c25 = arith.constant 25 : index
    %c0_51 = arith.constant 0 : index
    %52 = vector.load %arg5[%c0_50, %c25, %c0_51] : memref<2x64x4xf32, #tpu.memory_space<vmem>>, vector<1x16x4xf32>
    %53 = vector.shape_cast %52 : vector<1x16x4xf32> to vector<16x4xf32>
    %c0_52 = arith.constant 0 : index
    %c26 = arith.constant 26 : index
    %c0_53 = arith.constant 0 : index
    %54 = vector.load %arg5[%c0_52, %c26, %c0_53] : memref<2x64x4xf32, #tpu.memory_space<vmem>>, vector<1x16x4xf32>
    %55 = vector.shape_cast %54 : vector<1x16x4xf32> to vector<16x4xf32>
    %c0_54 = arith.constant 0 : index
    %c27 = arith.constant 27 : index
    %c0_55 = arith.constant 0 : index
    %56 = vector.load %arg5[%c0_54, %c27, %c0_55] : memref<2x64x4xf32, #tpu.memory_space<vmem>>, vector<1x16x4xf32>
    %57 = vector.shape_cast %56 : vector<1x16x4xf32> to vector<16x4xf32>
    %c0_56 = arith.constant 0 : index
    %c28 = arith.constant 28 : index
    %c0_57 = arith.constant 0 : index
    %58 = vector.load %arg5[%c0_56, %c28, %c0_57] : memref<2x64x4xf32, #tpu.memory_space<vmem>>, vector<1x16x4xf32>
    %59 = vector.shape_cast %58 : vector<1x16x4xf32> to vector<16x4xf32>
    %c0_58 = arith.constant 0 : index
    %c29 = arith.constant 29 : index
    %c0_59 = arith.constant 0 : index
    %60 = vector.load %arg5[%c0_58, %c29, %c0_59] : memref<2x64x4xf32, #tpu.memory_space<vmem>>, vector<1x16x4xf32>
    %61 = vector.shape_cast %60 : vector<1x16x4xf32> to vector<16x4xf32>
    %c0_60 = arith.constant 0 : index
    %c30 = arith.constant 30 : index
    %c0_61 = arith.constant 0 : index
    %62 = vector.load %arg5[%c0_60, %c30, %c0_61] : memref<2x64x4xf32, #tpu.memory_space<vmem>>, vector<1x16x4xf32>
    %63 = vector.shape_cast %62 : vector<1x16x4xf32> to vector<16x4xf32>
    %c0_62 = arith.constant 0 : index
    %c31 = arith.constant 31 : index
    %c0_63 = arith.constant 0 : index
    %64 = vector.load %arg5[%c0_62, %c31, %c0_63] : memref<2x64x4xf32, #tpu.memory_space<vmem>>, vector<1x16x4xf32>
    %65 = vector.shape_cast %64 : vector<1x16x4xf32> to vector<16x4xf32>
    %c0_64 = arith.constant 0 : index
    %c32 = arith.constant 32 : index
    %c0_65 = arith.constant 0 : index
    %66 = vector.load %arg5[%c0_64, %c32, %c0_65] : memref<2x64x4xf32, #tpu.memory_space<vmem>>, vector<1x16x4xf32>
    %67 = vector.shape_cast %66 : vector<1x16x4xf32> to vector<16x4xf32>
    %c0_66 = arith.constant 0 : index
    %c33 = arith.constant 33 : index
    %c0_67 = arith.constant 0 : index
    %68 = vector.load %arg5[%c0_66, %c33, %c0_67] : memref<2x64x4xf32, #tpu.memory_space<vmem>>, vector<1x16x4xf32>
    %69 = vector.shape_cast %68 : vector<1x16x4xf32> to vector<16x4xf32>
    %c0_68 = arith.constant 0 : index
    %c34 = arith.constant 34 : index
    %c0_69 = arith.constant 0 : index
    %70 = vector.load %arg5[%c0_68, %c34, %c0_69] : memref<2x64x4xf32, #tpu.memory_space<vmem>>, vector<1x16x4xf32>
    %71 = vector.shape_cast %70 : vector<1x16x4xf32> to vector<16x4xf32>
    %c0_70 = arith.constant 0 : index
    %c35 = arith.constant 35 : index
    %c0_71 = arith.constant 0 : index
    %72 = vector.load %arg5[%c0_70, %c35, %c0_71] : memref<2x64x4xf32, #tpu.memory_space<vmem>>, vector<1x16x4xf32>
    %73 = vector.shape_cast %72 : vector<1x16x4xf32> to vector<16x4xf32>
    %c0_72 = arith.constant 0 : index
    %c36 = arith.constant 36 : index
    %c0_73 = arith.constant 0 : index
    %74 = vector.load %arg5[%c0_72, %c36, %c0_73] : memref<2x64x4xf32, #tpu.memory_space<vmem>>, vector<1x16x4xf32>
    %75 = vector.shape_cast %74 : vector<1x16x4xf32> to vector<16x4xf32>
    %c0_74 = arith.constant 0 : index
    %c37 = arith.constant 37 : index
    %c0_75 = arith.constant 0 : index
    %76 = vector.load %arg5[%c0_74, %c37, %c0_75] : memref<2x64x4xf32, #tpu.memory_space<vmem>>, vector<1x16x4xf32>
    %77 = vector.shape_cast %76 : vector<1x16x4xf32> to vector<16x4xf32>
    %c0_76 = arith.constant 0 : index
    %c38 = arith.constant 38 : index
    %c0_77 = arith.constant 0 : index
    %78 = vector.load %arg5[%c0_76, %c38, %c0_77] : memref<2x64x4xf32, #tpu.memory_space<vmem>>, vector<1x16x4xf32>
    %79 = vector.shape_cast %78 : vector<1x16x4xf32> to vector<16x4xf32>
    %c0_78 = arith.constant 0 : index
    %c39 = arith.constant 39 : index
    %c0_79 = arith.constant 0 : index
    %80 = vector.load %arg5[%c0_78, %c39, %c0_79] : memref<2x64x4xf32, #tpu.memory_space<vmem>>, vector<1x16x4xf32>
    %81 = vector.shape_cast %80 : vector<1x16x4xf32> to vector<16x4xf32>
    %c0_80 = arith.constant 0 : index
    %c40_81 = arith.constant 40 : index
    %c0_82 = arith.constant 0 : index
    %82 = vector.load %arg5[%c0_80, %c40_81, %c0_82] : memref<2x64x4xf32, #tpu.memory_space<vmem>>, vector<1x16x4xf32>
    %83 = vector.shape_cast %82 : vector<1x16x4xf32> to vector<16x4xf32>
    %c0_83 = arith.constant 0 : index
    %c41 = arith.constant 41 : index
    %c0_84 = arith.constant 0 : index
    %84 = vector.load %arg5[%c0_83, %c41, %c0_84] : memref<2x64x4xf32, #tpu.memory_space<vmem>>, vector<1x16x4xf32>
    %85 = vector.shape_cast %84 : vector<1x16x4xf32> to vector<16x4xf32>
    %c0_85 = arith.constant 0 : index
    %c42 = arith.constant 42 : index
    %c0_86 = arith.constant 0 : index
    %86 = vector.load %arg5[%c0_85, %c42, %c0_86] : memref<2x64x4xf32, #tpu.memory_space<vmem>>, vector<1x16x4xf32>
    %87 = vector.shape_cast %86 : vector<1x16x4xf32> to vector<16x4xf32>
    %c0_87 = arith.constant 0 : index
    %c43 = arith.constant 43 : index
    %c0_88 = arith.constant 0 : index
    %88 = vector.load %arg5[%c0_87, %c43, %c0_88] : memref<2x64x4xf32, #tpu.memory_space<vmem>>, vector<1x16x4xf32>
    %89 = vector.shape_cast %88 : vector<1x16x4xf32> to vector<16x4xf32>
    %c0_89 = arith.constant 0 : index
    %c23_90 = arith.constant 23 : index
    %c0_91 = arith.constant 0 : index
    %90 = vector.load %arg5[%c0_89, %c23_90, %c0_91] : memref<2x64x4xf32, #tpu.memory_space<vmem>>, vector<1x16x4xf32>
    %91 = vector.shape_cast %90 : vector<1x16x4xf32> to vector<16x4xf32>
    %c0_92 = arith.constant 0 : index
    %c25_93 = arith.constant 25 : index
    %c0_94 = arith.constant 0 : index
    %92 = vector.load %arg5[%c0_92, %c25_93, %c0_94] : memref<2x64x4xf32, #tpu.memory_space<vmem>>, vector<1x16x4xf32>
    %93 = vector.shape_cast %92 : vector<1x16x4xf32> to vector<16x4xf32>
    %94 = tpu.iota {dimensions = array<i32: 0>} : vector<16x4xi32>
    %c0_i32 = arith.constant 0 : i32
    %95 = vector.broadcast %c0_i32 : i32 to vector<16x4xi32>
    %96 = arith.cmpi sgt, %94, %95 : vector<16x4xi32>
    %97 = arith.select %96, %91, %0 : vector<16x4xi1>, vector<16x4xf32>
    %c15_i32 = arith.constant 15 : i32
    %98 = vector.broadcast %c15_i32 : i32 to vector<16x4xi32>
    %99 = arith.cmpi slt, %94, %98 : vector<16x4xi32>
    %100 = arith.select %99, %93, %0 : vector<16x4xi1>, vector<16x4xf32>
    %101 = arith.maximumf %97, %100 : vector<16x4xf32>
    %102 = arith.maximumf %0, %101 : vector<16x4xf32>
    %103 = tpu.concatenate %13, %15, %17, %19, %21, %23, %25, %27, %29, %31, %33, %35, %37, %39, %41, %43 in 1 : vector<16x4xf32>, vector<16x4xf32>, vector<16x4xf32>, vector<16x4xf32>, vector<16x4xf32>, vector<16x4xf32>, vector<16x4xf32>, vector<16x4xf32>, vector<16x4xf32>, vector<16x4xf32>, vector<16x4xf32>, vector<16x4xf32>, vector<16x4xf32>, vector<16x4xf32>, vector<16x4xf32>, vector<16x4xf32> -> vector<16x64xf32>
    %104 = tpu.concatenate %45, %47, %49, %51, %53, %55, %57, %59, %61, %63, %65, %67, %69, %71, %73, %75 in 1 : vector<16x4xf32>, vector<16x4xf32>, vector<16x4xf32>, vector<16x4xf32>, vector<16x4xf32>, vector<16x4xf32>, vector<16x4xf32>, vector<16x4xf32>, vector<16x4xf32>, vector<16x4xf32>, vector<16x4xf32>, vector<16x4xf32>, vector<16x4xf32>, vector<16x4xf32>, vector<16x4xf32>, vector<16x4xf32> -> vector<16x64xf32>
    %105 = tpu.concatenate %77, %79, %81, %83, %85, %87, %89, %102 in 1 : vector<16x4xf32>, vector<16x4xf32>, vector<16x4xf32>, vector<16x4xf32>, vector<16x4xf32>, vector<16x4xf32>, vector<16x4xf32>, vector<16x4xf32> -> vector<16x32xf32>
    %106 = tpu.concatenate %103, %104, %105 in 1 : vector<16x64xf32>, vector<16x64xf32>, vector<16x32xf32> -> vector<16x160xf32>
    %c16_95 = arith.constant 16 : index
    %c0_96 = arith.constant 0 : index
    %107 = vector.load %arg1[%c16_95, %c0_96] : memref<32x4xf32, #tpu.memory_space<vmem>>, vector<16x4xf32>
    %cst_97 = arith.constant 0.000000e+00 : f32
    %108 = vector.broadcast %cst_97 : f32 to vector<24x4xf32>
    %c1 = arith.constant 1 : index
    %c0_98 = arith.constant 0 : index
    %c0_99 = arith.constant 0 : index
    %109 = vector.load %arg5[%c1, %c0_98, %c0_99] : memref<2x64x4xf32, #tpu.memory_space<vmem>>, vector<1x24x4xf32>
    %110 = vector.shape_cast %109 : vector<1x24x4xf32> to vector<24x4xf32>
    %111 = vector.shape_cast %108 : vector<24x4xf32> to vector<1x24x4xf32>
    tpu.vector_store %arg5[%c1, %c0_98, %c0_99], %111 {strides = array<i32>} : memref<2x64x4xf32, #tpu.memory_space<vmem>>, vector<1x24x4xf32>,
    %c1_100 = arith.constant 1 : index
    %c24_101 = arith.constant 24 : index
    %c0_102 = arith.constant 0 : index
    %112 = vector.load %arg5[%c1_100, %c24_101, %c0_102] : memref<2x64x4xf32, #tpu.memory_space<vmem>>, vector<1x16x4xf32>
    %113 = vector.shape_cast %112 : vector<1x16x4xf32> to vector<16x4xf32>
    %114 = vector.shape_cast %107 : vector<16x4xf32> to vector<1x16x4xf32>
    tpu.vector_store %arg5[%c1_100, %c24_101, %c0_102], %114 {strides = array<i32>} : memref<2x64x4xf32, #tpu.memory_space<vmem>>, vector<1x16x4xf32>,
    %cst_103 = arith.constant 0.000000e+00 : f32
    %115 = vector.broadcast %cst_103 : f32 to vector<24x4xf32>
    %c1_104 = arith.constant 1 : index
    %c40_105 = arith.constant 40 : index
    %c0_106 = arith.constant 0 : index
    %116 = vector.load %arg5[%c1_104, %c40_105, %c0_106] : memref<2x64x4xf32, #tpu.memory_space<vmem>>, vector<1x24x4xf32>
    %117 = vector.shape_cast %116 : vector<1x24x4xf32> to vector<24x4xf32>
    %118 = vector.shape_cast %115 : vector<24x4xf32> to vector<1x24x4xf32>
    tpu.vector_store %arg5[%c1_104, %c40_105, %c0_106], %118 {strides = array<i32>} : memref<2x64x4xf32, #tpu.memory_space<vmem>>, vector<1x24x4xf32>,
    %c1_107 = arith.constant 1 : index
    %c5_108 = arith.constant 5 : index
    %c0_109 = arith.constant 0 : index
    %119 = vector.load %arg5[%c1_107, %c5_108, %c0_109] : memref<2x64x4xf32, #tpu.memory_space<vmem>>, vector<1x16x4xf32>
    %120 = vector.shape_cast %119 : vector<1x16x4xf32> to vector<16x4xf32>
    %c1_110 = arith.constant 1 : index
    %c6_111 = arith.constant 6 : index
    %c0_112 = arith.constant 0 : index
    %121 = vector.load %arg5[%c1_110, %c6_111, %c0_112] : memref<2x64x4xf32, #tpu.memory_space<vmem>>, vector<1x16x4xf32>
    %122 = vector.shape_cast %121 : vector<1x16x4xf32> to vector<16x4xf32>
    %c1_113 = arith.constant 1 : index
    %c7_114 = arith.constant 7 : index
    %c0_115 = arith.constant 0 : index
    %123 = vector.load %arg5[%c1_113, %c7_114, %c0_115] : memref<2x64x4xf32, #tpu.memory_space<vmem>>, vector<1x16x4xf32>
    %124 = vector.shape_cast %123 : vector<1x16x4xf32> to vector<16x4xf32>
    %c1_116 = arith.constant 1 : index
    %c8_117 = arith.constant 8 : index
    %c0_118 = arith.constant 0 : index
    %125 = vector.load %arg5[%c1_116, %c8_117, %c0_118] : memref<2x64x4xf32, #tpu.memory_space<vmem>>, vector<1x16x4xf32>
    %126 = vector.shape_cast %125 : vector<1x16x4xf32> to vector<16x4xf32>
    %c1_119 = arith.constant 1 : index
    %c9_120 = arith.constant 9 : index
    %c0_121 = arith.constant 0 : index
    %127 = vector.load %arg5[%c1_119, %c9_120, %c0_121] : memref<2x64x4xf32, #tpu.memory_space<vmem>>, vector<1x16x4xf32>
    %128 = vector.shape_cast %127 : vector<1x16x4xf32> to vector<16x4xf32>
    %c1_122 = arith.constant 1 : index
    %c10_123 = arith.constant 10 : index
    %c0_124 = arith.constant 0 : index
    %129 = vector.load %arg5[%c1_122, %c10_123, %c0_124] : memref<2x64x4xf32, #tpu.memory_space<vmem>>, vector<1x16x4xf32>
    %130 = vector.shape_cast %129 : vector<1x16x4xf32> to vector<16x4xf32>
    %c1_125 = arith.constant 1 : index
    %c11_126 = arith.constant 11 : index
    %c0_127 = arith.constant 0 : index
    %131 = vector.load %arg5[%c1_125, %c11_126, %c0_127] : memref<2x64x4xf32, #tpu.memory_space<vmem>>, vector<1x16x4xf32>
    %132 = vector.shape_cast %131 : vector<1x16x4xf32> to vector<16x4xf32>
    %c1_128 = arith.constant 1 : index
    %c12_129 = arith.constant 12 : index
    %c0_130 = arith.constant 0 : index
    %133 = vector.load %arg5[%c1_128, %c12_129, %c0_130] : memref<2x64x4xf32, #tpu.memory_space<vmem>>, vector<1x16x4xf32>
    %134 = vector.shape_cast %133 : vector<1x16x4xf32> to vector<16x4xf32>
    %c1_131 = arith.constant 1 : index
    %c13_132 = arith.constant 13 : index
    %c0_133 = arith.constant 0 : index
    %135 = vector.load %arg5[%c1_131, %c13_132, %c0_133] : memref<2x64x4xf32, #tpu.memory_space<vmem>>, vector<1x16x4xf32>
    %136 = vector.shape_cast %135 : vector<1x16x4xf32> to vector<16x4xf32>
    %c1_134 = arith.constant 1 : index
    %c14_135 = arith.constant 14 : index
    %c0_136 = arith.constant 0 : index
    %137 = vector.load %arg5[%c1_134, %c14_135, %c0_136] : memref<2x64x4xf32, #tpu.memory_space<vmem>>, vector<1x16x4xf32>
    %138 = vector.shape_cast %137 : vector<1x16x4xf32> to vector<16x4xf32>
    %c1_137 = arith.constant 1 : index
    %c15_138 = arith.constant 15 : index
    %c0_139 = arith.constant 0 : index
    %139 = vector.load %arg5[%c1_137, %c15_138, %c0_139] : memref<2x64x4xf32, #tpu.memory_space<vmem>>, vector<1x16x4xf32>
    %140 = vector.shape_cast %139 : vector<1x16x4xf32> to vector<16x4xf32>
    %c1_140 = arith.constant 1 : index
    %c16_141 = arith.constant 16 : index
    %c0_142 = arith.constant 0 : index
    %141 = vector.load %arg5[%c1_140, %c16_141, %c0_142] : memref<2x64x4xf32, #tpu.memory_space<vmem>>, vector<1x16x4xf32>
    %142 = vector.shape_cast %141 : vector<1x16x4xf32> to vector<16x4xf32>
    %c1_143 = arith.constant 1 : index
    %c17_144 = arith.constant 17 : index
    %c0_145 = arith.constant 0 : index
    %143 = vector.load %arg5[%c1_143, %c17_144, %c0_145] : memref<2x64x4xf32, #tpu.memory_space<vmem>>, vector<1x16x4xf32>
    %144 = vector.shape_cast %143 : vector<1x16x4xf32> to vector<16x4xf32>
    %c1_146 = arith.constant 1 : index
    %c18_147 = arith.constant 18 : index
    %c0_148 = arith.constant 0 : index
    %145 = vector.load %arg5[%c1_146, %c18_147, %c0_148] : memref<2x64x4xf32, #tpu.memory_space<vmem>>, vector<1x16x4xf32>
    %146 = vector.shape_cast %145 : vector<1x16x4xf32> to vector<16x4xf32>
    %c1_149 = arith.constant 1 : index
    %c19_150 = arith.constant 19 : index
    %c0_151 = arith.constant 0 : index
    %147 = vector.load %arg5[%c1_149, %c19_150, %c0_151] : memref<2x64x4xf32, #tpu.memory_space<vmem>>, vector<1x16x4xf32>
    %148 = vector.shape_cast %147 : vector<1x16x4xf32> to vector<16x4xf32>
    %c1_152 = arith.constant 1 : index
    %c20_153 = arith.constant 20 : index
    %c0_154 = arith.constant 0 : index
    %149 = vector.load %arg5[%c1_152, %c20_153, %c0_154] : memref<2x64x4xf32, #tpu.memory_space<vmem>>, vector<1x16x4xf32>
    %150 = vector.shape_cast %149 : vector<1x16x4xf32> to vector<16x4xf32>
    %c1_155 = arith.constant 1 : index
    %c21_156 = arith.constant 21 : index
    %c0_157 = arith.constant 0 : index
    %151 = vector.load %arg5[%c1_155, %c21_156, %c0_157] : memref<2x64x4xf32, #tpu.memory_space<vmem>>, vector<1x16x4xf32>
    %152 = vector.shape_cast %151 : vector<1x16x4xf32> to vector<16x4xf32>
    %c1_158 = arith.constant 1 : index
    %c22_159 = arith.constant 22 : index
    %c0_160 = arith.constant 0 : index
    %153 = vector.load %arg5[%c1_158, %c22_159, %c0_160] : memref<2x64x4xf32, #tpu.memory_space<vmem>>, vector<1x16x4xf32>
    %154 = vector.shape_cast %153 : vector<1x16x4xf32> to vector<16x4xf32>
    %c1_161 = arith.constant 1 : index
    %c23_162 = arith.constant 23 : index
    %c0_163 = arith.constant 0 : index
    %155 = vector.load %arg5[%c1_161, %c23_162, %c0_163] : memref<2x64x4xf32, #tpu.memory_space<vmem>>, vector<1x16x4xf32>
    %156 = vector.shape_cast %155 : vector<1x16x4xf32> to vector<16x4xf32>
    %c1_164 = arith.constant 1 : index
    %c24_165 = arith.constant 24 : index
    %c0_166 = arith.constant 0 : index
    %157 = vector.load %arg5[%c1_164, %c24_165, %c0_166] : memref<2x64x4xf32, #tpu.memory_space<vmem>>, vector<1x16x4xf32>
    %158 = vector.shape_cast %157 : vector<1x16x4xf32> to vector<16x4xf32>
    %c1_167 = arith.constant 1 : index
    %c25_168 = arith.constant 25 : index
    %c0_169 = arith.constant 0 : index
    %159 = vector.load %arg5[%c1_167, %c25_168, %c0_169] : memref<2x64x4xf32, #tpu.memory_space<vmem>>, vector<1x16x4xf32>
    %160 = vector.shape_cast %159 : vector<1x16x4xf32> to vector<16x4xf32>
    %c1_170 = arith.constant 1 : index
    %c26_171 = arith.constant 26 : index
    %c0_172 = arith.constant 0 : index
    %161 = vector.load %arg5[%c1_170, %c26_171, %c0_172] : memref<2x64x4xf32, #tpu.memory_space<vmem>>, vector<1x16x4xf32>
    %162 = vector.shape_cast %161 : vector<1x16x4xf32> to vector<16x4xf32>
    %c1_173 = arith.constant 1 : index
    %c27_174 = arith.constant 27 : index
    %c0_175 = arith.constant 0 : index
    %163 = vector.load %arg5[%c1_173, %c27_174, %c0_175] : memref<2x64x4xf32, #tpu.memory_space<vmem>>, vector<1x16x4xf32>
    %164 = vector.shape_cast %163 : vector<1x16x4xf32> to vector<16x4xf32>
    %c1_176 = arith.constant 1 : index
    %c28_177 = arith.constant 28 : index
    %c0_178 = arith.constant 0 : index
    %165 = vector.load %arg5[%c1_176, %c28_177, %c0_178] : memref<2x64x4xf32, #tpu.memory_space<vmem>>, vector<1x16x4xf32>
    %166 = vector.shape_cast %165 : vector<1x16x4xf32> to vector<16x4xf32>
    %c1_179 = arith.constant 1 : index
    %c29_180 = arith.constant 29 : index
    %c0_181 = arith.constant 0 : index
    %167 = vector.load %arg5[%c1_179, %c29_180, %c0_181] : memref<2x64x4xf32, #tpu.memory_space<vmem>>, vector<1x16x4xf32>
    %168 = vector.shape_cast %167 : vector<1x16x4xf32> to vector<16x4xf32>
    %c1_182 = arith.constant 1 : index
    %c30_183 = arith.constant 30 : index
    %c0_184 = arith.constant 0 : index
    %169 = vector.load %arg5[%c1_182, %c30_183, %c0_184] : memref<2x64x4xf32, #tpu.memory_space<vmem>>, vector<1x16x4xf32>
    %170 = vector.shape_cast %169 : vector<1x16x4xf32> to vector<16x4xf32>
    %c1_185 = arith.constant 1 : index
    %c31_186 = arith.constant 31 : index
    %c0_187 = arith.constant 0 : index
    %171 = vector.load %arg5[%c1_185, %c31_186, %c0_187] : memref<2x64x4xf32, #tpu.memory_space<vmem>>, vector<1x16x4xf32>
    %172 = vector.shape_cast %171 : vector<1x16x4xf32> to vector<16x4xf32>
    %c1_188 = arith.constant 1 : index
    %c32_189 = arith.constant 32 : index
    %c0_190 = arith.constant 0 : index
    %173 = vector.load %arg5[%c1_188, %c32_189, %c0_190] : memref<2x64x4xf32, #tpu.memory_space<vmem>>, vector<1x16x4xf32>
    %174 = vector.shape_cast %173 : vector<1x16x4xf32> to vector<16x4xf32>
    %c1_191 = arith.constant 1 : index
    %c33_192 = arith.constant 33 : index
    %c0_193 = arith.constant 0 : index
    %175 = vector.load %arg5[%c1_191, %c33_192, %c0_193] : memref<2x64x4xf32, #tpu.memory_space<vmem>>, vector<1x16x4xf32>
    %176 = vector.shape_cast %175 : vector<1x16x4xf32> to vector<16x4xf32>
    %c1_194 = arith.constant 1 : index
    %c34_195 = arith.constant 34 : index
    %c0_196 = arith.constant 0 : index
    %177 = vector.load %arg5[%c1_194, %c34_195, %c0_196] : memref<2x64x4xf32, #tpu.memory_space<vmem>>, vector<1x16x4xf32>
    %178 = vector.shape_cast %177 : vector<1x16x4xf32> to vector<16x4xf32>
    %c1_197 = arith.constant 1 : index
    %c35_198 = arith.constant 35 : index
    %c0_199 = arith.constant 0 : index
    %179 = vector.load %arg5[%c1_197, %c35_198, %c0_199] : memref<2x64x4xf32, #tpu.memory_space<vmem>>, vector<1x16x4xf32>
    %180 = vector.shape_cast %179 : vector<1x16x4xf32> to vector<16x4xf32>
    %c1_200 = arith.constant 1 : index
    %c36_201 = arith.constant 36 : index
    %c0_202 = arith.constant 0 : index
    %181 = vector.load %arg5[%c1_200, %c36_201, %c0_202] : memref<2x64x4xf32, #tpu.memory_space<vmem>>, vector<1x16x4xf32>
    %182 = vector.shape_cast %181 : vector<1x16x4xf32> to vector<16x4xf32>
    %c1_203 = arith.constant 1 : index
    %c37_204 = arith.constant 37 : index
    %c0_205 = arith.constant 0 : index
    %183 = vector.load %arg5[%c1_203, %c37_204, %c0_205] : memref<2x64x4xf32, #tpu.memory_space<vmem>>, vector<1x16x4xf32>
    %184 = vector.shape_cast %183 : vector<1x16x4xf32> to vector<16x4xf32>
    %c1_206 = arith.constant 1 : index
    %c38_207 = arith.constant 38 : index
    %c0_208 = arith.constant 0 : index
    %185 = vector.load %arg5[%c1_206, %c38_207, %c0_208] : memref<2x64x4xf32, #tpu.memory_space<vmem>>, vector<1x16x4xf32>
    %186 = vector.shape_cast %185 : vector<1x16x4xf32> to vector<16x4xf32>
    %c1_209 = arith.constant 1 : index
    %c39_210 = arith.constant 39 : index
    %c0_211 = arith.constant 0 : index
    %187 = vector.load %arg5[%c1_209, %c39_210, %c0_211] : memref<2x64x4xf32, #tpu.memory_space<vmem>>, vector<1x16x4xf32>
    %188 = vector.shape_cast %187 : vector<1x16x4xf32> to vector<16x4xf32>
    %c1_212 = arith.constant 1 : index
    %c40_213 = arith.constant 40 : index
    %c0_214 = arith.constant 0 : index
    %189 = vector.load %arg5[%c1_212, %c40_213, %c0_214] : memref<2x64x4xf32, #tpu.memory_space<vmem>>, vector<1x16x4xf32>
    %190 = vector.shape_cast %189 : vector<1x16x4xf32> to vector<16x4xf32>
    %c1_215 = arith.constant 1 : index
    %c41_216 = arith.constant 41 : index
    %c0_217 = arith.constant 0 : index
    %191 = vector.load %arg5[%c1_215, %c41_216, %c0_217] : memref<2x64x4xf32, #tpu.memory_space<vmem>>, vector<1x16x4xf32>
    %192 = vector.shape_cast %191 : vector<1x16x4xf32> to vector<16x4xf32>
    %c1_218 = arith.constant 1 : index
    %c42_219 = arith.constant 42 : index
    %c0_220 = arith.constant 0 : index
    %193 = vector.load %arg5[%c1_218, %c42_219, %c0_220] : memref<2x64x4xf32, #tpu.memory_space<vmem>>, vector<1x16x4xf32>
    %194 = vector.shape_cast %193 : vector<1x16x4xf32> to vector<16x4xf32>
    %c1_221 = arith.constant 1 : index
    %c43_222 = arith.constant 43 : index
    %c0_223 = arith.constant 0 : index
    %195 = vector.load %arg5[%c1_221, %c43_222, %c0_223] : memref<2x64x4xf32, #tpu.memory_space<vmem>>, vector<1x16x4xf32>
    %196 = vector.shape_cast %195 : vector<1x16x4xf32> to vector<16x4xf32>
    %c1_224 = arith.constant 1 : index
    %c23_225 = arith.constant 23 : index
    %c0_226 = arith.constant 0 : index
    %197 = vector.load %arg5[%c1_224, %c23_225, %c0_226] : memref<2x64x4xf32, #tpu.memory_space<vmem>>, vector<1x16x4xf32>
    %198 = vector.shape_cast %197 : vector<1x16x4xf32> to vector<16x4xf32>
    %c1_227 = arith.constant 1 : index
    %c25_228 = arith.constant 25 : index
    %c0_229 = arith.constant 0 : index
    %199 = vector.load %arg5[%c1_227, %c25_228, %c0_229] : memref<2x64x4xf32, #tpu.memory_space<vmem>>, vector<1x16x4xf32>
    %200 = vector.shape_cast %199 : vector<1x16x4xf32> to vector<16x4xf32>
    %201 = tpu.iota {dimensions = array<i32: 0>} : vector<16x4xi32>
    %c0_i32_230 = arith.constant 0 : i32
    %202 = vector.broadcast %c0_i32_230 : i32 to vector<16x4xi32>
    %203 = arith.cmpi sgt, %201, %202 : vector<16x4xi32>
    %204 = arith.select %203, %198, %107 : vector<16x4xi1>, vector<16x4xf32>
    %c15_i32_231 = arith.constant 15 : i32
    %205 = vector.broadcast %c15_i32_231 : i32 to vector<16x4xi32>
    %206 = arith.cmpi slt, %201, %205 : vector<16x4xi32>
    %207 = arith.select %206, %200, %107 : vector<16x4xi1>, vector<16x4xf32>
    %208 = arith.maximumf %204, %207 : vector<16x4xf32>
    %209 = arith.maximumf %107, %208 : vector<16x4xf32>
    %210 = tpu.concatenate %120, %122, %124, %126, %128, %130, %132, %134, %136, %138, %140, %142, %144, %146, %148, %150 in 1 : vector<16x4xf32>, vector<16x4xf32>, vector<16x4xf32>, vector<16x4xf32>, vector<16x4xf32>, vector<16x4xf32>, vector<16x4xf32>, vector<16x4xf32>, vector<16x4xf32>, vector<16x4xf32>, vector<16x4xf32>, vector<16x4xf32>, vector<16x4xf32>, vector<16x4xf32>, vector<16x4xf32>, vector<16x4xf32> -> vector<16x64xf32>
    %211 = tpu.concatenate %152, %154, %156, %158, %160, %162, %164, %166, %168, %170, %172, %174, %176, %178, %180, %182 in 1 : vector<16x4xf32>, vector<16x4xf32>, vector<16x4xf32>, vector<16x4xf32>, vector<16x4xf32>, vector<16x4xf32>, vector<16x4xf32>, vector<16x4xf32>, vector<16x4xf32>, vector<16x4xf32>, vector<16x4xf32>, vector<16x4xf32>, vector<16x4xf32>, vector<16x4xf32>, vector<16x4xf32>, vector<16x4xf32> -> vector<16x64xf32>
    %212 = tpu.concatenate %184, %186, %188, %190, %192, %194, %196, %209 in 1 : vector<16x4xf32>, vector<16x4xf32>, vector<16x4xf32>, vector<16x4xf32>, vector<16x4xf32>, vector<16x4xf32>, vector<16x4xf32>, vector<16x4xf32> -> vector<16x32xf32>
    %213 = tpu.concatenate %210, %211, %212 in 1 : vector<16x64xf32>, vector<16x64xf32>, vector<16x32xf32> -> vector<16x160xf32>
    %214 = tpu.concatenate %106, %213 in 0 : vector<16x160xf32>, vector<16x160xf32> -> vector<32x160xf32>
    %c0_232 = arith.constant 0 : index
    %c0_233 = arith.constant 0 : index
    %215 = vector.load %arg2[%c0_232, %c0_233] : memref<160x128xf32, #tpu.memory_space<vmem>>, vector<160x128xf32>
    %cst_234 = arith.constant dense<0.000000e+00> : vector<32x128xf32>
    %216 = tpu.matmul %214, %215, %cst_234 {dimension_numbers = #tpu.dot_dimension_numbers<[1], [0], [0], [1], [0, 0, 1, 1], [], []>} : vector<32x160xf32>, vector<160x128xf32>, vector<32x128xf32> -> vector<32x128xf32>
    %c0_235 = arith.constant 0 : index
    %c0_236 = arith.constant 0 : index
    %217 = vector.load %arg3[%c0_235, %c0_236] : memref<32x128xf32, #tpu.memory_space<vmem>>, vector<32x128xf32>
    %218 = arith.addf %216, %217 : vector<32x128xf32>
    %cst_237 = arith.constant 0.000000e+00 : f32
    %219 = vector.broadcast %cst_237 : f32 to vector<32x128xf32>
    %220 = arith.maximumf %218, %219 : vector<32x128xf32>
    %c0_238 = arith.constant 0 : index
    %c0_239 = arith.constant 0 : index
    %221 = vector.load %arg4[%c0_238, %c0_239] : memref<32x128xf32, #tpu.memory_space<vmem>>, vector<32x128xf32>
    tpu.vector_store %arg4[%c0_238, %c0_239], %220 {strides = array<i32>} : memref<32x128xf32, #tpu.memory_space<vmem>>, vector<32x128xf32>,
    return
  }
  func.func @transform_0(%arg0: i32) -> (i32, i32) {
    %c0_i32 = arith.constant 0 : i32
    %c0_i32_0 = arith.constant 0 : i32
    %c0_i32_1 = arith.constant 0 : i32
    return %c0_i32, %c0_i32_0 : i32, i32
  }
  func.func @transform_1(%arg0: i32) -> (i32, i32) {
    %c0_i32 = arith.constant 0 : i32
    %c0_i32_0 = arith.constant 0 : i32
    %c0_i32_1 = arith.constant 0 : i32
    return %c0_i32, %c0_i32_0 : i32, i32
  }
  func.func @transform_2(%arg0: i32) -> (i32, i32) {
    %c0_i32 = arith.constant 0 : i32
    %c0_i32_0 = arith.constant 0 : i32
    %c0_i32_1 = arith.constant 0 : i32
    return %c0_i32, %c0_i32_0 : i32, i32
  }
  func.func @transform_3(%arg0: i32) -> (i32, i32) {
    %c0_i32 = arith.constant 0 : i32
    %c0_i32_0 = arith.constant 0 : i32
    %c0_i32_1 = arith.constant 0 : i32
    return %c0_i32, %c0_i32_0 : i32, i32
  }
}

</mosaic_0001>

<bundles_post_ra>
// kernel: tpu_custom_call.1
= control target key start
LH: loop header
LB: loop body
LE: loop exit
PB: predicated region body
PF: predicated region fallthrough
CT: control target
= control target key end

     0   :  { %8 = vsyncpa [#allocation4], 0  ;;  %s2144_s0 = inlined_call_operand.vmem [shape: f32[32,4], index: 0, kind: input, shape index: {}]   ;;  %s2145_s1 = inlined_call_operand.hbm [shape: f32[160,128], index: 1, kind: input, shape index: {}]   ;;  %s2146_s2 = inlined_call_operand.vmem [shape: f32[32,128], index: 2, kind: input, shape index: {}]   ;;  %s2147_s3 = inlined_call_operand.hbm [shape: f32[32,128], index: 3, kind: output, shape index: {}]  }
   0x1   :  { %9 = vsyncpa [#allocation5], 0  ;;  %s1455_s12 = smov [#allocation3]  }
   0x2   :  { %s17_s13 = sshll.u32 %s1455_s12, 4  ;;  %s18_s13 = int_to_ptr.vmem [resolvable:$true] %s17_s13 }
   0x3   :  { %s1419_s14 = scalar_lea.vmem %s18_s13, 2560  ;;  %p1424_p1 = scmp.lt.s32.totalorder %s18_s13, %s18_s13 }
   0x4   :  { %p1420_p0 = scmp.ne.s32.totalorder %s18_s13, %s1419_s14  ;;  %p1425_p2 = scmp.lt.s32.totalorder %s1419_s14, %s1419_s14 }
   0x6   :  { %p1426_p3 = por %p1425_p2, %p1424_p1 }
   0x8   :  { %p1427_p4 = pnand %p1426_p3, %p1420_p0 }
   0xa   :  { %1430 = shalt.err (!%p1427_p4)
}
   0xb   :  { %s1456_s15 = smov 128   ;;  %s1457_s16 = smov 8  }
   0xc   :  { %23 = dma.hbm_to_vmem [thread:$0]  %s2145_s1, 2560, %s18_s13, [#allocation4], %s1456_s15, %s1456_s15, %s1457_s16  }
   0xd   :  { %1451 = dma.done.wait [#allocation4], 2560  }
   0xe   :  { %1452 = vsyncadd [#allocation4], 4294964736  ;;  %vm31_vm0 = vcmask 31744   ;;  %v1458_v0 = vmov 0.0   ;;  %v1530_v1 = vld [vmem:[%s2144_s0] sm:$0xff]  ;;  %v1535_v2 = vld [vmem:[%s2144_s0 + $0x10] sm:$0xff]  ;;  %v87_v4 = vlaneseq }
   0xf   :  { %34 = vst.msk [vmem:[#allocation2 + $0x10] sm:$0xff] %vm31_vm0, %v1458_v0  ;;  %475 = vst.msk [vmem:[#allocation2 + $0x50] sm:$0xff] %vm31_vm0, %v1458_v0  ;;  %925 = vmatprep.subr.mxu0 %v1458_v0  ;;  %1039 = vmatprep.subr.mxu1 %v1458_v0  ;;  %v1540_v3 = vld [vmem:[%s2144_s0 + $0x8] sm:$0xff]  ;;  %v1551_v5 = vld [vmem:[%s2144_s0 + $0x18] sm:$0xff]  ;;  %s1459_s0 = smov 12   ;;  %s1460_s26 = smov 4  }
  0x10   :  { %32 = vst.msk [vmem:[#allocation2] sm:$0xff] %vm31_vm0, %v1458_v0  ;;  %33 = vst.msk [vmem:[#allocation2 + $0x8] sm:$0xff] %vm31_vm0, %v1458_v0  ;;  %v1555_v6 = vshrl.u32 %v87_v4, 7  ;;  %s1461_s27 = smov 16   ;;  %s1462_s28 = smov 20   ;;  %vm217_vm3 = vcmask 64512  }
  0x11   :  { %37 = vst.msk [vmem:[#allocation2 + $0x28] sm:$0xff] %vm31_vm0, %v1458_v0  ;;  %38 = vst.msk [vmem:[#allocation2 + $0x30] sm:$0xff] %vm31_vm0, %v1458_v0  ;;  %s1463_s29 = smov 24   ;;  %s1464_s30 = smov 28   ;;  %vm220_vm4 = vcmask 97280   ;;  %vm223_vm5 = vcmask 130048  }
  0x12   :  { %39 = vst.msk [vmem:[#allocation2 + $0x38] sm:$0xff] %vm31_vm0, %v1458_v0  ;;  %473 = vst.msk [vmem:[#allocation2 + $0x40] sm:$0xff] %vm31_vm0, %v1458_v0  ;;  %vm90_vm1 = vcmp.gt.s32.totalorder %v1555_v6, 0  ;;  %s1465_s4 = smov 32   ;;  %s1466_s5 = smov 36   ;;  %v89_v4 = vadd.s32 8, %v1555_v6 }
  0x13   :  { %474 = vst.msk [vmem:[#allocation2 + $0x48] sm:$0xff] %vm31_vm0, %v1458_v0  ;;  %478 = vst.msk [vmem:[#allocation2 + $0x68] sm:$0xff] %vm31_vm0, %v1458_v0  ;;  %s1467_s6 = smov 40   ;;  %s1468_s7 = smov 44   ;;  %vm226_vm6 = vcmask 162816   ;;  %vm229_vm7 = vcmask 195584  }
  0x14   :  { %479 = vst.msk [vmem:[#allocation2 + $0x70] sm:$0xff] %vm31_vm0, %v1458_v0  ;;  %480 = vst.msk [vmem:[#allocation2 + $0x78] sm:$0xff] %vm31_vm0, %v1458_v0  ;;  %s1469_s8 = smov 48   ;;  %s1470_s9 = smov 52   ;;  %vm95_vm2 = vcmp.lt.s32.totalorder %v89_v4, 15  ;;  %vm232_vm8 = vcmask 228352  }
  0x15   :  { %35 = vst.msk [vmem:[#allocation2 + $0x18] sm:$0xff] %vm31_vm0, %v1530_v1  ;;  %476 = vst.msk [vmem:[#allocation2 + $0x58] sm:$0xff] %vm31_vm0, %v1535_v2  ;;  %s1471_s10 = smov 56   ;;  %s1472_s11 = smov 60   ;;  %vm235_vm9 = vcmask 261120   ;;  %vm238_vm10 = vcmask 293888  }
  0x16   :  { %36 = vst.msk [vmem:[#allocation2 + $0x20] sm:$0xff] %vm31_vm0, %v1540_v3  ;;  %477 = vst.msk [vmem:[#allocation2 + $0x60] sm:$0xff] %vm31_vm0, %v1551_v5  ;;  %vm241_vm11 = vcmask 326656   ;;  %vm244_vm12 = vcmask 359424   ;;  %vm247_vm13 = vcmask 392192   ;;  %vm250_vm14 = vcmask 424960  }
  0x17   :  { %v54_v4 = vld [vmem:[#allocation2 + $0xc] sm:$0xff]  ;;  %vm253_vm15 = vcmask 457728   ;;  %s1473_s12 = smov 64   ;;  %s1474_s22 = smov [#allocation6]  }
  0x18   :  { %s1023_s23 = sshll.u32 %s1474_s22, 4  ;;  %s1024_s23 = int_to_ptr.vmem [resolvable:$true] %s1023_s23 }
  0x19   :  { %s1431_s24 = scalar_lea.vmem %s1024_s23, 512  ;;  %p1436_p6 = scmp.lt.s32.totalorder %s1024_s23, %s1024_s23 }
  0x1a   :  { %p1432_p5 = scmp.ne.s32.totalorder %s1024_s23, %s1431_s24  ;;  %p1437_p7 = scmp.lt.s32.totalorder %s1431_s24, %s1431_s24 }
  0x1c   :  { %v59_v7 = vld [vmem:[#allocation2 + $0x18] sm:$0xff]  ;;  %p1438_p8 = por %p1437_p7, %p1436_p6 }
  0x1d   :  { %v500_v8 = vld [vmem:[#allocation2 + $0x58] sm:$0xff]  ;;  %v67_v35 = vld [vmem:[#allocation2 + $0x20] sm:$0xff] }
  0x1e   :  { %v57_v9 = vld [vmem:[#allocation2 + $0x16] sm:$0xff]  ;;  %v1558_v10 = vpack.i.bf16 %v500_v8, %v59_v7  ;;  %v65_v23 = vld [vmem:[#allocation2 + $0x1e] sm:$0xff]  ;;  %v1620_v61 = vld [vmem:[#allocation2 + $0x26] sm:$0xff]  ;;  %p1439_p9 = pnand %p1438_p8, %p1432_p5 }
  0x1f   :  { %v498_v11 = vld [vmem:[#allocation2 + $0x56] sm:$0xff]  ;;  %v506_v24 = vld [vmem:[#allocation2 + $0x5e] sm:$0xff]  ;;  %v1622_v62 = vld [vmem:[#allocation2 + $0x66] sm:$0xff] }
  0x20   :  { %v60_v12 = vld [vmem:[#allocation2 + $0x19] sm:$0xff]  ;;  %v1560_v14 = vpack.i.bf16 %v498_v11, %v57_v9  ;;  %1110 = vrot.lane.b32.xlu1 %v1558_v10, %s1459_s0  ;;  %v1119_v26 = vpack.i.bf16 %v506_v24, %v65_v23  ;;  %v68_v42 = vld [vmem:[#allocation2 + $0x21] sm:$0xff]  ;;  %v1199_v63 = vpack.i.bf16 %v1622_v62, %v1620_v61  ;;  %v520_v23 = vld [vmem:[#allocation2 + $0x6c] sm:$0xff] }
  0x21   :  { %v501_v13 = vld [vmem:[#allocation2 + $0x59] sm:$0xff]  ;;  %v1598_v43 = vld [vmem:[#allocation2 + $0x61] sm:$0xff]  ;;  %v97_v8 = vsel %vm95_vm2, %v68_v42, %v1540_v3  ;;  %v1665_v24 = vld [vmem:[#allocation2 + $0x2b] sm:$0xff] }
  0x22   :  { %v58_v15 = vld [vmem:[#allocation2 + $0x17] sm:$0xff]  ;;  %v1564_v17 = vpack.i.bf16 %v501_v13, %v60_v12  ;;  %1100 = vrot.lane.b32.xlu0 %v1560_v14, %s1460_s26  ;;  %v1578_v29 = vld [vmem:[#allocation2 + $0x1f] sm:$0xff]  ;;  %v1149_v46 = vpack.i.bf16 %v1598_v43, %v68_v42  ;;  %v1639_v9 = vld [vmem:[#allocation2 + $0x28] sm:$0xff] }
  0x23   :  { %v499_v16 = vld [vmem:[#allocation2 + $0x57] sm:$0xff]  ;;  %v92_v19 = vsel %vm90_vm1, %v58_v15, %v1530_v1  ;;  %v1580_v30 = vld [vmem:[#allocation2 + $0x5f] sm:$0xff]  ;;  %v1641_v11 = vld [vmem:[#allocation2 + $0x68] sm:$0xff] }
  0x24   :  { %v528_v18 = vsel %vm90_vm1, %v499_v16, %v1535_v2  ;;  %v1568_v20 = vpack.i.bf16 %v499_v16, %v58_v15  ;;  %v61_v21 = vld [vmem:[#allocation2 + $0x1a] sm:$0xff]  ;;  %1115 = vrot.lane.b32.xlu1 %v1564_v17, %s1461_s27  ;;  %v1129_v32 = vpack.i.bf16 %v1580_v30, %v1578_v29  ;;  %v98_v41 = vmax.f32 %v92_v19, %v60_v12  ;;  %v69_v48 = vld [vmem:[#allocation2 + $0x22] sm:$0xff]  ;;  %v1651_v15 = vld [vmem:[#allocation2 + $0x2a] sm:$0xff] }
  0x25   :  { %v502_v22 = vld [vmem:[#allocation2 + $0x5a] sm:$0xff]  ;;  %v532_v47 = vmax.f32 %v528_v18, %v501_v13  ;;  %v510_v49 = vld [vmem:[#allocation2 + $0x62] sm:$0xff]  ;;  %v99_v12 = vmax.f32 %v1578_v29, %v97_v8  ;;  %v1219_v13 = vpack.i.bf16 %v1641_v11, %v1639_v9  ;;  %v1653_v16 = vld [vmem:[#allocation2 + $0x6a] sm:$0xff]  ;;  %vm256_vm1 = vcmask 490496  }
  0x26   :  { %v1574_v25 = vpack.i.bf16 %v502_v22, %v61_v21  ;;  %1105 = vrot.lane.b32.xlu0 %v1568_v20, %s1457_s16  ;;  %v62_v27 = vld [vmem:[#allocation2 + $0x1b] sm:$0xff]  ;;  %v1605_v45 = vmax.f32 %v1530_v1, %v98_v41  ;;  %v1159_v51 = vpack.i.bf16 %v510_v49, %v69_v48  ;;  %v70_v52 = vld [vmem:[#allocation2 + $0x23] sm:$0xff]  ;;  %v79_v22 = vld [vmem:[#allocation2 + $0x2c] sm:$0xff] }
  0x27   :  { %v503_v28 = vld [vmem:[#allocation2 + $0x5b] sm:$0xff]  ;;  %v1610_v50 = vmax.f32 %v1535_v2, %v532_v47  ;;  %v511_v53 = vld [vmem:[#allocation2 + $0x63] sm:$0xff]  ;;  %v1646_v6 = vmax.f32 %v1540_v3, %v99_v12  ;;  %v1234_v3 = vpack.i.bf16 %v1653_v16, %v1651_v15  ;;  %v47_v8 = vld [vmem:[#allocation2 + $0x10] sm:$0xff] }
  0x28   :  { %1125 = vrot.lane.b32.xlu1 %v1574_v25, %s1462_s28  ;;  %v1584_v31 = vpack.i.bf16 %v503_v28, %v62_v27  ;;  %v63_v33 = vld [vmem:[#allocation2 + $0x1c] sm:$0xff]  ;;  %v1169_v54 = vpack.i.bf16 %v511_v53, %v70_v52  ;;  %v71_v55 = vld [vmem:[#allocation2 + $0x24] sm:$0xff]  ;;  %v1244_v27 = vpack.i.bf16 %v520_v23, %v79_v22  ;;  %v484_v53 = vld [vmem:[#allocation2 + $0x4e] sm:$0xff] }
  0x29   :  { %v504_v34 = vld [vmem:[#allocation2 + $0x5c] sm:$0xff]  ;;  %v512_v56 = vld [vmem:[#allocation2 + $0x64] sm:$0xff]  ;;  %v488_v12 = vld [vmem:[#allocation2 + $0x50] sm:$0xff] }
  0x2a   :  { %1120 = vrot.lane.b32.xlu0 %v1119_v26, %s1460_s26  ;;  %v508_v36 = vld [vmem:[#allocation2 + $0x60] sm:$0xff]  ;;  %v1591_v37 = vpack.i.bf16 %v504_v34, %v63_v33  ;;  %v1179_v57 = vpack.i.bf16 %v512_v56, %v71_v55  ;;  %v1655_v18 = vld [vmem:[#allocation2 + $0x29] sm:$0xff]  ;;  %v49_v23 = vld [vmem:[#allocation2 + $0x11] sm:$0xff] }
  0x2b   :  { %v1139_v38 = vpack.i.bf16 %v508_v36, %v67_v35  ;;  %v1594_v39 = vld [vmem:[#allocation2 + $0x1d] sm:$0xff]  ;;  %v72_v58 = vld [vmem:[#allocation2 + $0x25] sm:$0xff]  ;;  %v1677_v36 = vsel %vm95_vm2, %v1598_v43, %v1551_v5  ;;  %v43_v43 = vld [vmem:[#allocation2 + $0xe] sm:$0xff]  ;;  %vm467_vm2 = vcmask 523264  }
  0x2c   :  { %1135 = vrot.lane.b32.xlu1 %v1584_v31, %s1463_s29  ;;  %v1596_v40 = vld [vmem:[#allocation2 + $0x5d] sm:$0xff]  ;;  %v513_v59 = vld [vmem:[#allocation2 + $0x65] sm:$0xff]  ;;  %v1269_v55 = vpack.i.bf16 %v484_v53, %v43_v43  ;;  %v1692_v22 = vld [vmem:[#allocation2 + $0x4d] sm:$0xff] }
  0x2d   :  { %v1154_v44 = vpack.i.bf16 %v1596_v40, %v1594_v39  ;;  %v1189_v60 = vpack.i.bf16 %v513_v59, %v72_v58  ;;  %v1628_v1 = vld [vmem:[#allocation2 + $0x27] sm:$0xff]  ;;  %v45_v58 = vld [vmem:[#allocation2 + $0xf] sm:$0xff] }
  0x2e   :  { %1130 = vrot.lane.b32.xlu0 %v1129_v32, %s1457_s16  ;;  %v1630_v2 = vld [vmem:[#allocation2 + $0x67] sm:$0xff]  ;;  %v486_v59 = vld [vmem:[#allocation2 + $0x4f] sm:$0xff] }
  0x2f   :  { %v1209_v7 = vpack.i.bf16 %v1630_v2, %v1628_v1  ;;  %v1657_v19 = vld [vmem:[#allocation2 + $0x69] sm:$0xff] }
  0x30   :  { %1145 = vrot.lane.b32.xlu1 %v1591_v37, %s1464_s30  ;;  %v1229_v21 = vpack.i.bf16 %v1657_v19, %v1655_v18  ;;  %v44_v29 = vld [vmem:[#allocation2 + $0x7] sm:$0xff] }
  0x31   :  { %v42_v33 = vld [vmem:[#allocation2 + $0x6] sm:$0xff] }
  0x32   :  { %1140 = vrot.lane.b32.xlu0 %v1139_v38, %s1459_s0  ;;  %v483_v34 = vld [vmem:[#allocation2 + $0x46] sm:$0xff] }
  0x33   :  { %v48_v41 = vld [vmem:[#allocation2 + $0x9] sm:$0xff] }
  0x34   :  { %1155 = vrot.lane.b32.xlu1 %v1154_v44, %s1465_s4  ;;  %v489_v42 = vld [vmem:[#allocation2 + $0x49] sm:$0xff]  ;;  %v533_v44 = vmax.f32 %v1580_v30, %v1677_v36 }
  0x35   :  { %v487_v47 = vld [vmem:[#allocation2 + $0x48] sm:$0xff]  ;;  %v1264_v48 = vpack.i.bf16 %v489_v42, %v48_v41  ;;  %v55_v42 = vld [vmem:[#allocation2 + $0x14] sm:$0xff] }
  0x36   :  { %1150 = vrot.lane.b32.xlu0 %v1149_v46, %s1461_s27  ;;  %v491_v52 = vld [vmem:[#allocation2 + $0x4a] sm:$0xff] }
  0x37   :  { %v52_v56 = vld [vmem:[#allocation2 + $0xb] sm:$0xff] }
  0x38   :  { %1165 = vrot.lane.b32.xlu1 %v1119_v26, %s1466_s5  ;;  %v1667_v26 = vld [vmem:[#allocation2 + $0x6b] sm:$0xff] }
  0x39   :  { %v1239_v28 = vpack.i.bf16 %v1667_v26, %v1665_v24  ;;  %v902_v43 = vld [vmem:[#allocation3 + $0x68] sm:$0xff] }
  0x3a   :  { %1160 = vrot.lane.b32.xlu0 %v1159_v51, %s1462_s28 }
  0x3c   :  { %1175 = vrot.lane.b32.xlu1 %v1129_v32, %s1467_s6  ;;  %v485_v32 = vld [vmem:[#allocation2 + $0x47] sm:$0xff] }
  0x3d   :  { %v1254_v35 = vpack.i.bf16 %v485_v32, %v44_v29  ;;  %v51_v32 = vld [vmem:[#allocation2 + $0x12] sm:$0xff] }
  0x3e   :  { %1170 = vrot.lane.b32.xlu0 %v1169_v54, %s1463_s29 }
  0x40   :  { %1185 = vrot.lane.b32.xlu1 %v1139_v38, %s1468_s7  ;;  %v1249_v38 = vpack.i.bf16 %v483_v34, %v42_v33  ;;  %v492_v33 = vld [vmem:[#allocation2 + $0x52] sm:$0xff] }
  0x41   :  { %v1309_v34 = vpack.i.bf16 %v492_v33, %v51_v32  ;;  %v895_v32 = vld [vmem:[#allocation3 + $0x30] sm:$0xff] }
  0x42   :  { %1180 = vrot.lane.b32.xlu0 %v1179_v57, %s1464_s30 }
  0x44   :  { %1195 = vrot.lane.b32.xlu1 %v1149_v46, %s1469_s8  ;;  %v46_v46 = vld [vmem:[#allocation2 + $0x8] sm:$0xff] }
  0x45   :  { %v1259_v49 = vpack.i.bf16 %v487_v47, %v46_v46  ;;  %v496_v46 = vld [vmem:[#allocation2 + $0x54] sm:$0xff] }
  0x46   :  { %1190 = vrot.lane.b32.xlu0 %v1189_v60, %s1465_s4  ;;  %v1712_v47 = vpack.i.bf16 %v496_v46, %v55_v42  ;;  %v83_v42 = vld [vmem:[#allocation2 + $0x30] sm:$0xff] }
  0x48   :  { %1205 = vrot.lane.b32.xlu1 %v1159_v51, %s1470_s9  ;;  %v50_v51 = vld [vmem:[#allocation2 + $0xa] sm:$0xff] }
  0x4a   :  { %1200 = vrot.lane.b32.xlu0 %v1199_v63, %s1466_s5  ;;  %v1279_v63 = vpack.i.bf16 %v486_v59, %v45_v58  ;;  %v899_v58 = vld [vmem:[#allocation3 + $0x50] sm:$0xff] }
  0x4c   :  { %1215 = vrot.lane.b32.xlu1 %v1169_v54, %s1471_s10  ;;  %v1274_v54 = vpack.i.bf16 %v491_v52, %v50_v51  ;;  %v904_v51 = vld [vmem:[#allocation3 + $0x78] sm:$0xff]  ;;  %v522_v52 = vld [vmem:[#allocation2 + $0x6e] sm:$0xff] }
  0x4d   :  { %926 = vmatpush1.msra.mxu0 %v904_v51  ;;  %1059 = vmatpush1.msra.mxu1 %v904_v51 }
  0x4e   :  { %1210 = vrot.lane.b32.xlu0 %v1209_v7, %s1467_s6  ;;  %v495_v7 = vld [vmem:[#allocation2 + $0x4c] sm:$0xff]  ;;  %927 = vmatprep.subr.mxu0 %v1458_v0 }
  0x4f   :  { %1040 = vmatprep.subr.mxu1 %v1458_v0 }
  0x50   :  { %1225 = vrot.lane.b32.xlu1 %v1179_v57, %s1472_s11  ;;  %v493_v57 = vld [vmem:[#allocation2 + $0x4b] sm:$0xff] }
  0x51   :  { %v1284_v60 = vpack.i.bf16 %v493_v57, %v52_v56  ;;  %v82_v56 = vld [vmem:[#allocation2 + $0x2f] sm:$0xff] }
  0x52   :  { %1220 = vrot.lane.b32.xlu0 %v1219_v13, %s1468_s7  ;;  %v1294_v13 = vpack.i.bf16 %v495_v7, %v54_v4  ;;  %v523_v4 = vld [vmem:[#allocation2 + $0x6f] sm:$0xff] }
  0x54   :  { %1235 = vrot.lane.b32.xlu1 %v1234_v3, %s1470_s9  ;;  %v1289_v3 = vpack.i.bf16 %v488_v12, %v47_v8 }
  0x56   :  { %1230 = vrot.lane.b32.xlu0 %v1229_v21, %s1469_s8  ;;  %v1690_v21 = vld [vmem:[#allocation2 + $0xd] sm:$0xff] }
  0x58   :  { %1245 = vrot.lane.b32.xlu1 %v1244_v27, %s1472_s11  ;;  %v490_v27 = vld [vmem:[#allocation2 + $0x51] sm:$0xff] }
  0x59   :  { %v1299_v29 = vpack.i.bf16 %v490_v27, %v49_v23  ;;  %v896_v27 = vld [vmem:[#allocation3 + $0x38] sm:$0xff] }
  0x5a   :  { %1240 = vrot.lane.b32.xlu0 %v1239_v28, %s1471_s10  ;;  %v1304_v28 = vpack.i.bf16 %v1692_v22, %v1690_v21 }
  0x5c   :  { %1255 = vrot.lane.b32.xlu1 %v1254_v35, %s1457_s16  ;;  %v53_v35 = vld [vmem:[#allocation2 + $0x13] sm:$0xff] }
  0x5e   :  { %1250 = vrot.lane.b32.xlu0 %v1249_v38, %s1460_s26  ;;  %v494_v38 = vld [vmem:[#allocation2 + $0x53] sm:$0xff] }
  0x5f   :  { %v1319_v41 = vpack.i.bf16 %v494_v38, %v53_v35 }
  0x60   :  { %1265 = vrot.lane.b32.xlu1 %v1264_v48, %s1461_s27 }
  0x62   :  { %1260 = vrot.lane.b32.xlu0 %v1259_v49, %s1459_s0 }
  0x64   :  { %1275 = vrot.lane.b32.xlu1 %v1274_v54, %s1462_s28 }
  0x66   :  { %1270 = vrot.lane.b32.xlu0 %v1269_v55, %s1460_s26 }
  0x68   :  { %1285 = vrot.lane.b32.xlu1 %v1284_v60, %s1463_s29 }
  0x6a   :  { %1280 = vrot.lane.b32.xlu0 %v1279_v63, %s1457_s16 }
  0x6c   :  { %1295 = vrot.lane.b32.xlu1 %v1294_v13, %s1464_s30 }
  0x6e   :  { %1290 = vrot.lane.b32.xlu0 %v1289_v3, %s1459_s0 }
  0x70   :  { %1305 = vrot.lane.b32.xlu1 %v1304_v28, %s1465_s4 }
  0x72   :  { %1300 = vrot.lane.b32.xlu0 %v1299_v29, %s1461_s27 }
  0x74   :  { %1315 = vrot.lane.b32.xlu1 %v1269_v55, %s1466_s5 }
  0x76   :  { %1310 = vrot.lane.b32.xlu0 %v1309_v34, %s1462_s28 }
  0x78   :  { %816 = vrot.lane.b32.xlu1 %v1622_v62, %s1460_s26  ;;  %v1719_v62 = vld [vmem:[#allocation2 + $0x55] sm:$0xff] }
  0x7a   :  { %396 = vrot.lane.b32.xlu0 %v1620_v61, %s1460_s26  ;;  %v1717_v61 = vld [vmem:[#allocation2 + $0x15] sm:$0xff] }
  0x7c   :  { %1325 = vrot.lane.b32.xlu1 %v1279_v63, %s1467_s6 }
  0x7e   :  { %1320 = vrot.lane.b32.xlu0 %v1319_v41, %s1463_s29 }
  0x80   :  { %823 = vrot.lane.b32.xlu1 %v1630_v2, %s1457_s16 }
  0x82   :  { %403 = vrot.lane.b32.xlu0 %v1628_v1, %s1457_s16  ;;  %v1339_v1 = vpack.i.bf16 %v1719_v62, %v1717_v61 }
  0x84   :  { %1335 = vrot.lane.b32.xlu1 %v1289_v3, %s1468_s7 }
  0x86   :  { %1330 = vrot.lane.b32.xlu0 %v1712_v47, %s1464_s30 }
  0x88   :  { %830 = vrot.lane.b32.xlu1 %v1641_v11, %s1459_s0  ;;  %v81_v11 = vld [vmem:[#allocation2 + $0x2e] sm:$0xff] }
  0x8a   :  { %410 = vrot.lane.b32.xlu0 %v1639_v9, %s1459_s0 }
  0x8c   :  { %1345 = vrot.lane.b32.xlu1 %v1299_v29, %s1469_s8 }
  0x8e   :  { %1340 = vrot.lane.b32.xlu0 %v1339_v1, %s1465_s4 }
  0x90   :  { %837 = vrot.lane.b32.xlu1 %v1657_v19, %s1461_s27 }
  0x92   :  { %417 = vrot.lane.b32.xlu0 %v1655_v18, %s1461_s27  ;;  %v1733_v2 = vpop.permute.xlu1 %1110  ;;  %v903_v18 = vld [vmem:[#allocation3 + $0x70] sm:$0xff] }
  0x93   :  { %928 = vmatpush1.msra.mxu0 %v903_v18  ;;  %1060 = vmatpush1.msra.mxu1 %v903_v18  ;;  %v1113_v33 = vunpack.i.h.bf16 %v1733_v2 }
  0x94   :  { %v1735_v48 = vpop.permute.xlu0 %1100  ;;  %1355 = vrot.lane.b32.xlu1 %v1309_v34, %s1470_s9  ;;  %929 = vmatprep.subr.mxu0 %v1458_v0  ;;  %v1112_v34 = vunpack.i.l.bf16 %v1733_v2 }
  0x95   :  { %1041 = vmatprep.subr.mxu1 %v1458_v0  ;;  %930 = vmatpush1.msra.mxu0 %v902_v43  ;;  %v1103_v59 = vunpack.i.h.bf16 %v1735_v48  ;;  %v1102_v60 = vunpack.i.l.bf16 %v1735_v48 }
  0x96   :  { %1350 = vrot.lane.b32.xlu0 %v1560_v14, %s1466_s5  ;;  %v1740_v9 = vpop.permute.xlu1 %1115  ;;  %1061 = vmatpush1.msra.mxu1 %v902_v43 }
  0x97   :  { %931 = vmatprep.subr.mxu0 %v1458_v0  ;;  %1042 = vmatprep.subr.mxu1 %v1458_v0  ;;  %v785_v13 = vsel %vm31_vm0, %v1719_v62, %v1103_v59  ;;  %v365_v3 = vsel %vm31_vm0, %v1717_v61, %v1102_v60  ;;  %v894_v61 = vld [vmem:[#allocation3 + $0x28] sm:$0xff]  ;;  %v1118_v62 = vunpack.i.h.bf16 %v1740_v9  ;;  %v1117_v1 = vunpack.i.l.bf16 %v1740_v9  ;;  %v524_v9 = vld [vmem:[#allocation2 + $0x70] sm:$0xff] }
  0x98   :  { %v1742_v49 = vpop.permute.xlu0 %1105  ;;  %424 = vrot.lane.b32.xlu1 %v1651_v15, %s1462_s28  ;;  %v901_v15 = vld [vmem:[#allocation3 + $0x60] sm:$0xff] }
  0x99   :  { %932 = vmatpush1.msra.mxu0 %v901_v15  ;;  %1062 = vmatpush1.msra.mxu1 %v901_v15  ;;  %v1108_v8 = vunpack.i.h.bf16 %v1742_v49  ;;  %v1107_v12 = vunpack.i.l.bf16 %v1742_v49 }
  0x9a   :  { %398 = vrot.lane.b32.xlu0 %v81_v11, %s1460_s26  ;;  %v1747_v19 = vpop.permute.xlu1 %1125  ;;  %933 = vmatprep.subr.mxu0 %v1458_v0 }
  0x9b   :  { %1043 = vmatprep.subr.mxu1 %v1458_v0  ;;  %v367_v28 = vsel %vm217_vm3, %v365_v3, %v1107_v12  ;;  %v787_v29 = vsel %vm217_vm3, %v785_v13, %v1108_v8  ;;  %v1128_v11 = vunpack.i.h.bf16 %v1747_v19  ;;  %v1127_v49 = vunpack.i.l.bf16 %v1747_v19 }
  0x9c   :  { %v1751_v14 = vpop.permute.xlu0 %1120  ;;  %844 = vrot.lane.b32.xlu1 %v1653_v16, %s1462_s28  ;;  %v900_v16 = vld [vmem:[#allocation3 + $0x58] sm:$0xff]  ;;  %v369_v46 = vsel %vm220_vm4, %v367_v28, %v1112_v34 }
  0x9d   :  { %934 = vmatpush1.msra.mxu0 %v900_v16  ;;  %1063 = vmatpush1.msra.mxu1 %v900_v16  ;;  %v1123_v35 = vunpack.i.h.bf16 %v1751_v14  ;;  %v1122_v38 = vunpack.i.l.bf16 %v1751_v14 }
  0x9e   :  { %818 = vrot.lane.b32.xlu0 %v522_v52, %s1460_s26  ;;  %v1758_v53 = vpop.permute.xlu1 %1135  ;;  %935 = vmatprep.subr.mxu0 %v1458_v0  ;;  %v371_v52 = vsel %vm223_vm5, %v369_v46, %v1117_v1 }
  0x9f   :  { %1044 = vmatprep.subr.mxu1 %v1458_v0  ;;  %936 = vmatpush1.msra.mxu0 %v899_v58  ;;  %v366_v51 = vsel %vm31_vm0, %v1594_v39, %v1122_v38  ;;  %v1138_v43 = vunpack.i.h.bf16 %v1758_v53  ;;  %v1137_v19 = vunpack.i.l.bf16 %v1758_v53  ;;  %v893_v39 = vld [vmem:[#allocation3 + $0x20] sm:$0xff]  ;;  %v373_v59 = vsel %vm226_vm6, %v371_v52, %v1127_v49  ;;  %v525_v38 = vld [vmem:[#allocation2 + $0x71] sm:$0xff] }
  0xa0   :  { %v1760_v54 = vpop.permute.xlu0 %1130  ;;  %1365 = vrot.lane.b32.xlu1 %v1319_v41, %s1471_s10  ;;  %1064 = vmatpush1.msra.mxu1 %v899_v58 }
  0xa1   :  { %937 = vmatprep.subr.mxu0 %v1458_v0  ;;  %1045 = vmatprep.subr.mxu1 %v1458_v0  ;;  %v1133_v2 = vunpack.i.h.bf16 %v1760_v54  ;;  %v1132_v48 = vunpack.i.l.bf16 %v1760_v54 }
  0xa2   :  { %1360 = vrot.lane.b32.xlu0 %v1568_v20, %s1467_s6  ;;  %v1767_v55 = vpop.permute.xlu1 %1145  ;;  %v898_v20 = vld [vmem:[#allocation3 + $0x48] sm:$0xff] }
  0xa3   :  { %938 = vmatpush1.msra.mxu0 %v898_v20  ;;  %1065 = vmatpush1.msra.mxu1 %v898_v20  ;;  %v368_v16 = vsel %vm217_vm3, %v366_v51, %v1132_v48  ;;  %v1147_v58 = vunpack.i.l.bf16 %v1767_v55  ;;  %v84_v20 = vld [vmem:[#allocation2 + $0x31] sm:$0xff]  ;;  %v889_v51 = vld [vmem:[#allocation3] sm:$0xff] }
  0xa4   :  { %v1771_v57 = vpop.permute.xlu0 %1140  ;;  %431 = vrot.lane.b32.xlu1 %v1665_v24, %s1463_s29  ;;  %v897_v24 = vld [vmem:[#allocation3 + $0x40] sm:$0xff]  ;;  %939 = vmatprep.subr.mxu0 %v1458_v0 }
  0xa5   :  { %1046 = vmatprep.subr.mxu1 %v1458_v0  ;;  %940 = vmatpush1.msra.mxu0 %v897_v24  ;;  %v1142_v54 = vunpack.i.l.bf16 %v1771_v57 }
  0xa6   :  { %405 = vrot.lane.b32.xlu0 %v82_v56, %s1457_s16  ;;  %v1780_v63 = vpop.permute.xlu1 %1155  ;;  %1066 = vmatpush1.msra.mxu1 %v897_v24  ;;  %v1148_v56 = vunpack.i.h.bf16 %v1767_v55  ;;  %v375_v55 = vsel %vm229_vm7, %v373_v59, %v1137_v19 }
  0xa7   :  { %941 = vmatprep.subr.mxu0 %v1458_v0  ;;  %1047 = vmatprep.subr.mxu1 %v1458_v0  ;;  %v1158_v60 = vunpack.i.h.bf16 %v1780_v63 }
  0xa8   :  { %v1782_v7 = vpop.permute.xlu0 %1150  ;;  %851 = vrot.lane.b32.xlu1 %v1667_v26, %s1463_s29  ;;  %942 = vmatpush1.msra.mxu0 %v896_v27 }
  0xa9   :  { %1067 = vmatpush1.msra.mxu1 %v896_v27  ;;  %943 = vmatprep.subr.mxu0 %v1458_v0  ;;  %v1153_v12 = vunpack.i.h.bf16 %v1782_v7  ;;  %v1152_v13 = vunpack.i.l.bf16 %v1782_v7  ;;  %v891_v7 = vld [vmem:[#allocation3 + $0x10] sm:$0xff] }
  0xaa   :  { %825 = vrot.lane.b32.xlu0 %v523_v4, %s1457_s16  ;;  %v1795_v23 = vpop.permute.xlu1 %1165  ;;  %1048 = vmatprep.subr.mxu1 %v1458_v0  ;;  %v1157_v4 = vunpack.i.l.bf16 %v1780_v63  ;;  %v370_v63 = vsel %vm220_vm4, %v368_v16, %v1142_v54 }
  0xab   :  { %944 = vmatpush1.msra.mxu0 %v895_v32  ;;  %1068 = vmatpush1.msra.mxu1 %v895_v32  ;;  %v1168_v28 = vunpack.i.h.bf16 %v1795_v23  ;;  %v377_v32 = vsel %vm232_vm8, %v375_v55, %v1147_v58 }
  0xac   :  { %v1799_v26 = vpop.permute.xlu0 %1160  ;;  %1375 = vrot.lane.b32.xlu1 %v1712_v47, %s1472_s11  ;;  %v789_v47 = vsel %vm220_vm4, %v787_v29, %v1113_v33  ;;  %945 = vmatprep.subr.mxu0 %v1458_v0  ;;  %v1167_v29 = vunpack.i.l.bf16 %v1795_v23  ;;  %v379_v23 = vsel %vm235_vm9, %v377_v32, %v1157_v4 }
  0xad   :  { %1049 = vmatprep.subr.mxu1 %v1458_v0  ;;  %v791_v14 = vsel %vm223_vm5, %v789_v47, %v1118_v62  ;;  %946 = vmatpush1.msra.mxu0 %v894_v61  ;;  %v1163_v34 = vunpack.i.h.bf16 %v1799_v26 }
  0xae   :  { %1370 = vrot.lane.b32.xlu0 %v1558_v10, %s1468_s7  ;;  %v1813_v41 = vpop.permute.xlu1 %1175  ;;  %1069 = vmatpush1.msra.mxu1 %v894_v61 }
  0xaf   :  { %947 = vmatprep.subr.mxu0 %v1458_v0  ;;  %1050 = vmatprep.subr.mxu1 %v1458_v0  ;;  %v1178_v46 = vunpack.i.h.bf16 %v1813_v41  ;;  %v1177_v47 = vunpack.i.l.bf16 %v1813_v41  ;;  %v381_v41 = vsel %vm238_vm10, %v379_v23, %v1167_v29 }
  0xb0   :  { %v1815_v10 = vpop.permute.xlu0 %1170  ;;  %439 = vrot.lane.b32.xlu1 %v1605_v45, %s1464_s30  ;;  %v786_v45 = vsel %vm31_vm0, %v1596_v40, %v1123_v35  ;;  %v1143_v40 = vunpack.i.h.bf16 %v1771_v57  ;;  %v892_v57 = vld [vmem:[#allocation3 + $0x18] sm:$0xff]  ;;  %948 = vmatpush1.msra.mxu0 %v893_v39  ;;  %v1162_v35 = vunpack.i.l.bf16 %v1799_v26  ;;  %v890_v26 = vld [vmem:[#allocation3 + $0x8] sm:$0xff] }
  0xb1   :  { %v788_v53 = vsel %vm217_vm3, %v786_v45, %v1133_v2  ;;  %1070 = vmatpush1.msra.mxu1 %v893_v39  ;;  %949 = vmatprep.subr.mxu0 %v1458_v0  ;;  %v1173_v1 = vunpack.i.h.bf16 %v1815_v10  ;;  %v1172_v2 = vunpack.i.l.bf16 %v1815_v10  ;;  %v383_v19 = vsel %vm241_vm11, %v381_v41, %v1177_v47 }
  0xb2   :  { %412 = vrot.lane.b32.xlu0 %v83_v42, %s1459_s0  ;;  %v1834_v18 = vpop.permute.xlu1 %1185  ;;  %1051 = vmatprep.subr.mxu1 %v1458_v0  ;;  %v790_v27 = vsel %vm220_vm4, %v788_v53, %v1143_v40 }
  0xb3   :  { %950 = vmatpush1.msra.mxu0 %v892_v57  ;;  %1071 = vmatpush1.msra.mxu1 %v892_v57  ;;  %v792_v62 = vsel %vm223_vm5, %v790_v27, %v1153_v12  ;;  %v1188_v49 = vunpack.i.h.bf16 %v1834_v18  ;;  %v1187_v45 = vunpack.i.l.bf16 %v1834_v18  ;;  %v907_v12 = vld [vmem:[#allocation3 + $0x90] sm:$0xff] }
  0xb4   :  { %v1842_v15 = vpop.permute.xlu0 %1180  ;;  %859 = vrot.lane.b32.xlu1 %v1610_v50, %s1464_s30  ;;  %v793_v50 = vsel %vm226_vm6, %v791_v14, %v1128_v11  ;;  %951 = vmatprep.subr.mxu0 %v1458_v0  ;;  %v794_v10 = vsel %vm226_vm6, %v792_v62, %v1163_v34  ;;  %v527_v62 = vld [vmem:[#allocation2 + $0x73] sm:$0xff] }
  0xb5   :  { %v795_v8 = vsel %vm229_vm7, %v793_v50, %v1138_v43  ;;  %1052 = vmatprep.subr.mxu1 %v1458_v0  ;;  %952 = vmatpush1.msra.mxu0 %v891_v7  ;;  %v1183_v52 = vunpack.i.h.bf16 %v1842_v15  ;;  %v1182_v14 = vunpack.i.l.bf16 %v1842_v15  ;;  %v85_v43 = vld [vmem:[#allocation2 + $0x32] sm:$0xff]  ;;  %v796_v15 = vsel %vm229_vm7, %v794_v10, %v1173_v1 }
  0xb6   :  { %832 = vrot.lane.b32.xlu0 %v524_v9, %s1459_s0  ;;  %v1859_v24 = vpop.permute.xlu1 %1195  ;;  %v797_v33 = vsel %vm232_vm8, %v795_v8, %v1148_v56  ;;  %1072 = vmatpush1.msra.mxu1 %v891_v7  ;;  %v385_v57 = vsel %vm244_vm12, %v383_v19, %v1187_v45 }
  0xb7   :  { %v799_v42 = vsel %vm235_vm9, %v797_v33, %v1158_v60  ;;  %953 = vmatprep.subr.mxu0 %v1458_v0  ;;  %1053 = vmatprep.subr.mxu1 %v1458_v0  ;;  %v1198_v39 = vunpack.i.h.bf16 %v1859_v24  ;;  %v1197_v40 = vunpack.i.l.bf16 %v1859_v24  ;;  %v798_v24 = vsel %vm232_vm8, %v796_v15, %v1183_v52 }
  0xb8   :  { %v1865_v3 = vpop.permute.xlu0 %1190  ;;  %419 = vrot.lane.b32.xlu1 %v84_v20, %s1461_s27  ;;  %v801_v11 = vsel %vm238_vm10, %v799_v42, %v1168_v28  ;;  %954 = vmatpush1.msra.mxu0 %v890_v26  ;;  %v908_v20 = vld [vmem:[#allocation3 + $0x98] sm:$0xff] }
  0xb9   :  { %v803_v18 = vsel %vm241_vm11, %v801_v11, %v1178_v46  ;;  %1073 = vmatpush1.msra.mxu1 %v890_v26  ;;  %955 = vmatprep.subr.mxu0 %v1458_v0  ;;  %v1193_v55 = vunpack.i.h.bf16 %v1865_v3  ;;  %v1192_v8 = vunpack.i.l.bf16 %v1865_v3 }
  0xba   :  { %1380 = vrot.lane.b32.xlu0 %v1564_v17, %s1469_s8  ;;  %v1884_v61 = vpop.permute.xlu1 %1205  ;;  %v372_v17 = vsel %vm223_vm5, %v370_v63, %v1152_v13  ;;  %1054 = vmatprep.subr.mxu1 %v1458_v0  ;;  %v805_v59 = vsel %vm244_vm12, %v803_v18, %v1188_v49  ;;  %v387_v13 = vsel %vm247_vm13, %v385_v57, %v1197_v40  ;;  %v526_v57 = vld [vmem:[#allocation2 + $0x72] sm:$0xff] }
  0xbb   :  { %v374_v9 = vsel %vm226_vm6, %v372_v17, %v1162_v35  ;;  %v1208_v53 = vunpack.i.h.bf16 %v1884_v61  ;;  %v1207_v56 = vunpack.i.l.bf16 %v1884_v61  ;;  %956 = vmatpush1.msra.mxu0 %v889_v51  ;;  %1074 = vmatpush1.msra.mxu1 %v889_v51  ;;  %v807_v63 = vsel %vm247_vm13, %v805_v59, %v1198_v39  ;;  %v906_v35 = vld [vmem:[#allocation3 + $0x88] sm:$0xff] }
  0xbc   :  { %v1892_v48 = vpop.permute.xlu0 %1200  ;;  %839 = vrot.lane.b32.xlu1 %v525_v38, %s1461_s27  ;;  %v376_v16 = vsel %vm229_vm7, %v374_v9, %v1172_v2  ;;  %981 = vmatprep.subr.mxu0 %v1458_v0  ;;  %v800_v2 = vsel %vm235_vm9, %v798_v24, %v1193_v55  ;;  %v40_v55 = vld [vmem:[#allocation2 + $0x5] sm:$0xff] }
  0xbd   :  { %v378_v4 = vsel %vm232_vm8, %v376_v16, %v1182_v14  ;;  %1055 = vmatprep.subr.mxu1 %v1458_v0  ;;  %v1203_v27 = vunpack.i.h.bf16 %v1892_v48  ;;  %v1202_v28 = vunpack.i.l.bf16 %v1892_v48  ;;  %982 = vmatpush2.msra.mxu0 %v908_v20  ;;  %v389_v7 = vsel %vm250_vm14, %v387_v13, %v1207_v56 }
  0xbe   :  { %v1216_v54 = vpop.permute.xlu1 %1215  ;;  %1075 = vmatpush2.msra.mxu1 %v908_v20  ;;  %v809_v3 = vsel %vm250_vm14, %v807_v63, %v1208_v53  ;;  %983 = vmatprep.subr.mxu0 %v1458_v0  ;;  %v380_v1 = vsel %vm235_vm9, %v378_v4, %v1192_v8  ;;  %v481_v8 = vld [vmem:[#allocation2 + $0x45] sm:$0xff] }
  0xbf   :  { %v1218_v50 = vunpack.i.h.bf16 %v1216_v54  ;;  %v1217_v60 = vunpack.i.l.bf16 %v1216_v54  ;;  %1056 = vmatprep.subr.mxu1 %v1458_v0  ;;  %984 = vmatpush2.msra.mxu0 %v907_v12  ;;  %v382_v11 = vsel %vm238_vm10, %v380_v1, %v1202_v28  ;;  %v802_v49 = vsel %vm238_vm10, %v800_v2, %v1203_v27  ;;  %v86_v28 = vld [vmem:[#allocation2 + $0x33] sm:$0xff] }
  0xc0   :  { %v1211_v58 = vpop.permute.xlu0 %1210  ;;  %426 = vrot.lane.b32.xlu1 %v85_v43, %s1462_s28  ;;  %1076 = vmatpush2.msra.mxu1 %v907_v12 }
  0xc1   :  { %v391_v38 = vsel %vm253_vm15, %v389_v7, %v1217_v60  ;;  %v811_v23 = vsel %vm253_vm15, %v809_v3, %v1218_v50  ;;  %v1213_v42 = vunpack.i.h.bf16 %v1211_v58  ;;  %v1212_v46 = vunpack.i.l.bf16 %v1211_v58  ;;  %985 = vmatprep.subr.mxu0 %v1458_v0  ;;  %1057 = vmatprep.subr.mxu1 %v1458_v0 }
  0xc2   :  { %v1226_v29 = vpop.permute.xlu1 %1225  ;;  %986 = vmatpush2.msra.mxu0 %v906_v35  ;;  %1077 = vmatpush2.msra.mxu1 %v906_v35 }
  0xc3   :  { %v1228_v32 = vunpack.i.h.bf16 %v1226_v29  ;;  %v1227_v33 = vunpack.i.l.bf16 %v1226_v29  ;;  %987 = vmatprep.subr.mxu0 %v1458_v0  ;;  %v384_v51 = vsel %vm241_vm11, %v382_v11, %v1212_v46  ;;  %v804_v9 = vsel %vm241_vm11, %v802_v49, %v1213_v42  ;;  %1058 = vmatprep.subr.mxu1 %v1458_v0 }
  0xc4   :  { %v1221_v34 = vpop.permute.xlu0 %1220  ;;  %1395 = vrot.lane.b32.xlu1 %v1584_v31, %s1471_s10  ;;  %v905_v31 = vld [vmem:[#allocation3 + $0x80] sm:$0xff] }
  0xc5   :  { %v1223_v47 = vunpack.i.h.bf16 %v1221_v34  ;;  %v1222_v61 = vunpack.i.l.bf16 %v1221_v34  ;;  %v393_v26 = vsel %vm256_vm1, %v391_v38, %v1227_v33  ;;  %v813_v17 = vsel %vm256_vm1, %v811_v23, %v1228_v32  ;;  %988 = vmatpush2.msra.mxu0 %v905_v31  ;;  %1078 = vmatpush2.msra.mxu1 %v905_v31 }
  0xc6   :  { %v1236_v48 = vpop.permute.xlu1 %1235  ;;  %v1384_v41 = vpack.i.bf16 %v813_v17, %v393_v26  ;;  %v535_v31 = vmax.f32 %v1551_v5, %v533_v44 }
  0xc7   :  { %v386_v14 = vsel %vm244_vm12, %v384_v51, %v1222_v61  ;;  %v806_v43 = vsel %vm244_vm12, %v804_v9, %v1223_v47  ;;  %v1238_v19 = vunpack.i.h.bf16 %v1236_v48  ;;  %v1237_v18 = vunpack.i.l.bf16 %v1236_v48 }
  0xc8   :  { %v1231_v45 = vpop.permute.xlu0 %1230  ;;  %1385 = vrot.lane.b32.xlu0 %v1384_v41, %s1473_s12  ;;  %853 = vrot.lane.b32.xlu1 %v527_v62, %s1463_s29 }
  0xc9   :  { %v1233_v10 = vunpack.i.h.bf16 %v1231_v45  ;;  %v1232_v52 = vunpack.i.l.bf16 %v1231_v45 }
  0xca   :  { %v1246_v54 = vpop.permute.xlu1 %1245 }
  0xcb   :  { %v388_v39 = vsel %vm247_vm13, %v386_v14, %v1232_v52  ;;  %v808_v40 = vsel %vm247_vm13, %v806_v43, %v1233_v10  ;;  %v1248_v16 = vunpack.i.h.bf16 %v1246_v54  ;;  %v1247_v15 = vunpack.i.l.bf16 %v1246_v54 }
  0xcc   :  { %v1241_v53 = vpop.permute.xlu0 %1240  ;;  %1390 = vrot.lane.b32.xlu0 %v1574_v25, %s1470_s9  ;;  %441 = vrot.lane.b32.xlu1 %v1646_v6, %s1464_s30  ;;  %v390_v0 = vsel %vm250_vm14, %v388_v39, %v1237_v18  ;;  %v810_v20 = vsel %vm250_vm14, %v808_v40, %v1238_v19 }
  0xcd   :  { %v1243_v56 = vunpack.i.h.bf16 %v1241_v53  ;;  %v1242_v58 = vunpack.i.l.bf16 %v1241_v53 }
  0xce   :  { %v1256_v60 = vpop.permute.xlu1 %1255 }
  0xcf   :  { %v392_v59 = vsel %vm253_vm15, %v390_v0, %v1242_v58  ;;  %v812_v50 = vsel %vm253_vm15, %v810_v20, %v1243_v56  ;;  %v1258_v4 = vunpack.i.h.bf16 %v1256_v60  ;;  %v1257_v24 = vunpack.i.l.bf16 %v1256_v60 }
  0xd0   :  { %v1251_v12 = vpop.permute.xlu0 %1250  ;;  %v394_v25 = vsel %vm256_vm1, %v392_v59, %v1247_v15  ;;  %v814_v13 = vsel %vm256_vm1, %v812_v50, %v1248_v16  ;;  %846 = vrot.lane.b32.xlu0 %v526_v57, %s1462_s28 }
  0xd1   :  { %v1253_v6 = vunpack.i.h.bf16 %v1251_v12  ;;  %v1252_v63 = vunpack.i.l.bf16 %v1251_v12  ;;  %v1404_v27 = vpack.i.bf16 %v814_v13, %v394_v25 }
  0xd2   :  { %v1266_v3 = vpop.permute.xlu1 %1265 }
  0xd3   :  { %v649_v29 = vsel %vm31_vm0, %v481_v8, %v1253_v6  ;;  %v215_v7 = vsel %vm31_vm0, %v40_v55, %v1252_v63  ;;  %1405 = vrot.lane.b32.xlu1 %v1404_v27, %s1473_s12  ;;  %v1268_v32 = vunpack.i.h.bf16 %v1266_v3  ;;  %v1267_v33 = vunpack.i.l.bf16 %v1266_v3 }
  0xd4   :  { %v1261_v34 = vpop.permute.xlu0 %1260  ;;  %v218_v35 = vsel %vm217_vm3, %v215_v7, %v1257_v24  ;;  %v651_v38 = vsel %vm217_vm3, %v649_v29, %v1258_v4  ;;  %433 = vrot.lane.b32.xlu0 %v86_v28, %s1463_s29 }
  0xd5   :  { %v1263_v23 = vunpack.i.h.bf16 %v1261_v34  ;;  %v1262_v42 = vunpack.i.l.bf16 %v1261_v34 }
  0xd6   :  { %v1276_v61 = vpop.permute.xlu1 %1275 }
  0xd7   :  { %v221_v46 = vsel %vm220_vm4, %v218_v35, %v1262_v42  ;;  %v653_v47 = vsel %vm220_vm4, %v651_v38, %v1263_v23  ;;  %v1278_v26 = vunpack.i.h.bf16 %v1276_v61  ;;  %v1277_v17 = vunpack.i.l.bf16 %v1276_v61 }
  0xd8   :  { %v224_v62 = vsel %vm223_vm5, %v221_v46, %v1267_v33  ;;  %v655_v1 = vsel %vm223_vm5, %v653_v47, %v1268_v32  ;;  %v1271_v2 = vpop.permute.xlu0 %1270  ;;  %1400 = vrot.lane.b32.xlu0 %v1591_v37, %s1472_s11 }
  0xd9   :  { %v1273_v48 = vunpack.i.h.bf16 %v1271_v2  ;;  %v1272_v41 = vunpack.i.l.bf16 %v1271_v2  ;;  %v227_v11 = vsel %vm226_vm6, %v224_v62, %v1277_v17  ;;  %v657_v49 = vsel %vm226_vm6, %v655_v1, %v1278_v26 }
  0xda   :  { %v1286_v45 = vpop.permute.xlu1 %1285 }
  0xdb   :  { %v650_v51 = vsel %vm31_vm0, %v1692_v22, %v1273_v48  ;;  %v216_v9 = vsel %vm31_vm0, %v1690_v21, %v1272_v41  ;;  %v1288_v10 = vunpack.i.h.bf16 %v1286_v45  ;;  %v1287_v52 = vunpack.i.l.bf16 %v1286_v45 }
  0xdc   :  { %v1281_v14 = vpop.permute.xlu0 %1280  ;;  %861 = vrot.lane.b32.xlu0 %v535_v31, %s1464_s30 }
  0xdd   :  { %v1283_v37 = vunpack.i.h.bf16 %v1281_v14  ;;  %v1282_v43 = vunpack.i.l.bf16 %v1281_v14  ;;  %v230_v5 = vsel %vm229_vm7, %v227_v11, %v1287_v52  ;;  %v659_v30 = vsel %vm229_vm7, %v657_v49, %v1288_v10 }
  0xde   :  { %v1296_v19 = vpop.permute.xlu1 %1295 }
  0xdf   :  { %v219_v36 = vsel %vm217_vm3, %v216_v9, %v1282_v43  ;;  %v652_v44 = vsel %vm217_vm3, %v650_v51, %v1283_v37  ;;  %v1298_v22 = vunpack.i.h.bf16 %v1296_v19  ;;  %v1297_v18 = vunpack.i.l.bf16 %v1296_v19 }
  0xe0   :  { %v1291_v39 = vpop.permute.xlu0 %1290 }
  0xe1   :  { %v1293_v21 = vunpack.i.h.bf16 %v1291_v39  ;;  %v1292_v40 = vunpack.i.l.bf16 %v1291_v39  ;;  %v233_v54 = vsel %vm232_vm8, %v230_v5, %v1297_v18  ;;  %v661_v16 = vsel %vm232_vm8, %v659_v30, %v1298_v22  ;;  %v1409_v39 = vld [vmem:[#allocation2 + $0x25] sm:$0xff] }
  0xe2   :  { %v1306_v56 = vpop.permute.xlu1 %1305 }
  0xe3   :  { %v222_v15 = vsel %vm220_vm4, %v219_v36, %v1292_v40  ;;  %v654_v53 = vsel %vm220_vm4, %v652_v44, %v1293_v21  ;;  %v1308_v58 = vunpack.i.h.bf16 %v1306_v56  ;;  %v1307_v0 = vunpack.i.l.bf16 %v1306_v56 }
  0xe4   :  { %v1301_v20 = vpop.permute.xlu0 %1300 }
  0xe5   :  { %v1303_v57 = vunpack.i.h.bf16 %v1301_v20  ;;  %v1302_v59 = vunpack.i.l.bf16 %v1301_v20  ;;  %v236_v50 = vsel %vm235_vm9, %v233_v54, %v1307_v0  ;;  %v663_v60 = vsel %vm235_vm9, %v661_v16, %v1308_v58 }
  0xe6   :  { %v1316_v55 = vpop.permute.xlu1 %1315 }
  0xe7   :  { %v656_v4 = vsel %vm223_vm5, %v654_v53, %v1303_v57  ;;  %v225_v24 = vsel %vm223_vm5, %v222_v15, %v1302_v59  ;;  %v1318_v8 = vunpack.i.h.bf16 %v1316_v55  ;;  %v1317_v12 = vunpack.i.l.bf16 %v1316_v55  ;;  %v1410_v15 = vld [vmem:[#allocation2 + $0x65] sm:$0xff] }
  0xe8   :  { %v1311_v25 = vpop.permute.xlu0 %1310 }
  0xe9   :  { %v1313_v13 = vunpack.i.h.bf16 %v1311_v25  ;;  %v1312_v6 = vunpack.i.l.bf16 %v1311_v25  ;;  %v239_v63 = vsel %vm238_vm10, %v236_v50, %v1317_v12  ;;  %v665_v27 = vsel %vm238_vm10, %v663_v60, %v1318_v8 }
  0xea   :  { %v817_v7 = vpop.permute.xlu1 %816 }
  0xeb   :  { %v228_v28 = vsel %vm226_vm6, %v225_v24, %v1312_v6  ;;  %v658_v29 = vsel %vm226_vm6, %v656_v4, %v1313_v13  ;;  %v865_v53 = vsel %vm31_vm0, %v1410_v15, %v817_v7 }
  0xec   :  { %v397_v3 = vpop.permute.xlu0 %396 }
  0xed   :  { %v445_v21 = vsel %vm31_vm0, %v1409_v39, %v397_v3 }
  0xee   :  { %v1326_v32 = vpop.permute.xlu1 %1325 }
  0xef   :  { %v1328_v33 = vunpack.i.h.bf16 %v1326_v32  ;;  %v1327_v34 = vunpack.i.l.bf16 %v1326_v32 }
  0xf0   :  { %v1321_v35 = vpop.permute.xlu0 %1320 }
  0xf1   :  { %v1323_v38 = vunpack.i.h.bf16 %v1321_v35  ;;  %v1322_v23 = vunpack.i.l.bf16 %v1321_v35  ;;  %v2005_v42 = vsel %vm241_vm11, %v239_v63, %v1327_v34  ;;  %v2008_v46 = vsel %vm241_vm11, %v665_v27, %v1328_v33 }
  0xf2   :  { %v824_v26 = vpop.permute.xlu1 %823 }
  0xf3   :  { %v231_v47 = vsel %vm229_vm7, %v228_v28, %v1322_v23  ;;  %v660_v61 = vsel %vm229_vm7, %v658_v29, %v1323_v38  ;;  %v867_v20 = vsel %vm217_vm3, %v865_v53, %v824_v26  ;;  %v521_v53 = vld [vmem:[#allocation2 + $0x6d] sm:$0xff] }
  0xf4   :  { %v404_v17 = vpop.permute.xlu0 %403 }
  0xf5   :  { %v447_v40 = vsel %vm217_vm3, %v445_v21, %v404_v17 }
  0xf6   :  { %v2012_v62 = vpop.permute.xlu1 %1335 }
  0xf7   :  { %v1338_v29 = vunpack.i.h.bf16 %v2012_v62  ;;  %v1337_v7 = vunpack.i.l.bf16 %v2012_v62 }
  0xf8   :  { %v1331_v1 = vpop.permute.xlu0 %1330 }
  0xf9   :  { %v1333_v2 = vunpack.i.h.bf16 %v1331_v1  ;;  %v1332_v48 = vunpack.i.l.bf16 %v1331_v1  ;;  %v669_v26 = vsel %vm244_vm12, %v2008_v46, %v1338_v29 }
  0xfa   :  { %v831_v11 = vpop.permute.xlu1 %830 }
  0xfb   :  { %v2015_v41 = vsel %vm232_vm8, %v231_v47, %v1332_v48  ;;  %v2018_v31 = vsel %vm232_vm8, %v660_v61, %v1333_v2  ;;  %v869_v50 = vsel %vm220_vm4, %v867_v20, %v831_v11  ;;  %v245_v61 = vsel %vm244_vm12, %v2005_v42, %v1337_v7 }
  0xfc   :  { %v411_v49 = vpop.permute.xlu0 %410 }
  0xfd   :  { %v449_v56 = vsel %vm220_vm4, %v447_v40, %v411_v49 }
  0xfe   :  { %v1346_v45 = vpop.permute.xlu1 %1345 }
  0xff   :  { %v1348_v3 = vunpack.i.h.bf16 %v1346_v45  ;;  %v1347_v32 = vunpack.i.l.bf16 %v1346_v45 }
 0x100   :  { %v2020_v51 = vpop.permute.xlu0 %1340 }
 0x101   :  { %v671_v2 = vsel %vm247_vm13, %v669_v26, %v1348_v3  ;;  %v248_v62 = vsel %vm247_vm13, %v245_v61, %v1347_v32  ;;  %v1342_v39 = vunpack.i.l.bf16 %v2020_v51 }
 0x102   :  { %v838_v9 = vpop.permute.xlu1 %837 }
 0x103   :  { %v871_v4 = vsel %vm223_vm5, %v869_v50, %v838_v9 }
 0x104   :  { %v418_v10 = vpop.permute.xlu0 %417 }
 0x105   :  { %v451_v58 = vsel %vm223_vm5, %v449_v56, %v418_v10 }
 0x106   :  { %v1356_v52 = vpop.permute.xlu1 %1355 }
 0x107   :  { %v1358_v33 = vunpack.i.h.bf16 %v1356_v52  ;;  %v1357_v34 = vunpack.i.l.bf16 %v1356_v52 }
 0x108   :  { %v2022_v14 = vpop.permute.xlu0 %1350 }
 0x109   :  { %v251_v48 = vsel %vm250_vm14, %v248_v62, %v1357_v34  ;;  %v673_v11 = vsel %vm250_vm14, %v671_v2, %v1358_v33  ;;  %v1352_v40 = vunpack.i.l.bf16 %v2022_v14 }
 0x10a   :  { %v425_v37 = vpop.permute.xlu1 %424 }
 0x10b   :  { %v453_v0 = vsel %vm226_vm6, %v451_v58, %v425_v37  ;;  %v80_v37 = vld [vmem:[#allocation2 + $0x2d] sm:$0xff]  ;;  %v237_v58 = vsel %vm235_vm9, %v2015_v41, %v1342_v39 }
 0x10c   :  { %v2024_v43 = vpop.permute.xlu0 %398 }
 0x10d   :  { %v446_v15 = vsel %vm31_vm0, %v80_v37, %v2024_v43 }
 0x10e   :  { %v845_v5 = vpop.permute.xlu1 %844 }
 0x10f   :  { %v873_v55 = vsel %vm226_vm6, %v871_v4, %v845_v5 }
 0x110   :  { %v2026_v30 = vpop.permute.xlu0 %818 }
 0x111   :  { %v866_v41 = vsel %vm31_vm0, %v521_v53, %v2026_v30  ;;  %v912_v53 = vld [vmem:[%s2146_s2 + $0x18] sm:$0xff] }
 0x112   :  { %v1366_v36 = vpop.permute.xlu1 %1365 }
 0x113   :  { %v1368_v38 = vunpack.i.h.bf16 %v1366_v36  ;;  %v1367_v23 = vunpack.i.l.bf16 %v1366_v36 }
 0x114   :  { %v2028_v44 = vpop.permute.xlu0 %1360 }
 0x115   :  { %v254_v10 = vsel %vm253_vm15, %v251_v48, %v1367_v23  ;;  %v675_v42 = vsel %vm253_vm15, %v673_v11, %v1368_v38  ;;  %v1362_v56 = vunpack.i.l.bf16 %v2028_v44 }
 0x116   :  { %v432_v19 = vpop.permute.xlu1 %431 }
 0x117   :  { %v455_v57 = vsel %vm229_vm7, %v453_v0, %v432_v19 }
 0x118   :  { %v2030_v22 = vpop.permute.xlu0 %405 }
 0x11a   :  { %v852_v18 = vpop.permute.xlu1 %851 }
 0x11b   :  { %v875_v8 = vsel %vm229_vm7, %v873_v55, %v852_v18  ;;  %v1343_v18 = vunpack.i.h.bf16 %v2020_v51  ;;  %v1363_v51 = vunpack.i.h.bf16 %v2028_v44 }
 0x11c   :  { %v2034_v54 = vpop.permute.xlu0 %825 }
 0x11d   :  { %v664_v0 = vsel %vm235_vm9, %v2018_v31, %v1343_v18  ;;  %v868_v3 = vsel %vm217_vm3, %v866_v41, %v2034_v54 }
 0x11e   :  { %v1376_v16 = vpop.permute.xlu1 %1375 }
 0x11f   :  { %v1378_v17 = vunpack.i.h.bf16 %v1376_v16  ;;  %v1377_v1 = vunpack.i.l.bf16 %v1376_v16  ;;  %v1353_v16 = vunpack.i.h.bf16 %v2022_v14  ;;  %v448_v14 = vsel %vm217_vm3, %v446_v15, %v2030_v22 }
 0x120   :  { %v2045_v24 = vpop.permute.xlu0 %1370 }
 0x121   :  { %v257_v46 = vsel %vm256_vm1, %v254_v10, %v1377_v1  ;;  %v677_v52 = vsel %vm256_vm1, %v675_v42, %v1378_v17  ;;  %v1372_v20 = vunpack.i.l.bf16 %v2045_v24  ;;  %v1373_v43 = vunpack.i.h.bf16 %v2045_v24 }
 0x122   :  { %v440_v59 = vpop.permute.xlu1 %439  ;;  %v666_v4 = vsel %vm238_vm10, %v664_v0, %v1353_v16  ;;  %v910_v16 = vld [vmem:[%s2146_s2 + $0x8] sm:$0xff] }
 0x123   :  { %v457_v60 = vsel %vm232_vm8, %v455_v57, %v440_v59  ;;  %v240_v59 = vsel %vm238_vm10, %v237_v58, %v1352_v40  ;;  %v668_v22 = vsel %vm241_vm11, %v666_v4, %v1363_v51 }
 0x124   :  { %1035 = vmatprep.mubr.msk.f32.mxu0 %vm235_vm9, %v457_v60  ;;  %v413_v13 = vpop.permute.xlu0 %412  ;;  %v243_v55 = vsel %vm241_vm11, %v240_v59, %v1362_v56  ;;  %v670_v30 = vsel %vm244_vm12, %v668_v22, %v1373_v43 }
 0x125   :  { %v450_v31 = vsel %vm220_vm4, %v448_v14, %v413_v13  ;;  %v246_v24 = vsel %vm244_vm12, %v243_v55, %v1372_v20 }
 0x126   :  { %v860_v12 = vpop.permute.xlu1 %859 }
 0x127   :  { %v877_v25 = vsel %vm232_vm8, %v875_v8, %v860_v12 }
 0x128   :  { %1037 = vmatprep.mubr.msk.f32.mxu1 %vm235_vm9, %v877_v25  ;;  %v2054_v27 = vpop.permute.xlu0 %832 }
 0x12a   :  { %v420_v6 = vpop.permute.xlu1 %419 }
 0x12b   :  { %v452_v8 = vsel %vm223_vm5, %v450_v31, %v420_v6 }
 0x12c   :  { %v1381_v35 = vpop.permute.xlu0 %1380 }
 0x12d   :  { %v1382_v50 = vunpack.i.l.bf16 %v1381_v35  ;;  %v1383_v44 = vunpack.i.h.bf16 %v1381_v35 }
 0x12e   :  { %v2052_v63 = vpop.permute.xlu1 %839 }
 0x12f   :  { %v249_v13 = vsel %vm247_vm13, %v246_v24, %v1382_v50  ;;  %v672_v6 = vsel %vm247_vm13, %v670_v30, %v1383_v44 }
 0x132   :  { %v427_v28 = vpop.permute.xlu1 %426 }
 0x133   :  { %v454_v29 = vsel %vm226_vm6, %v452_v8, %v427_v28  ;;  %v870_v28 = vsel %vm220_vm4, %v868_v3, %v2054_v27 }
 0x134   :  { %v872_v61 = vsel %vm223_vm5, %v870_v28, %v2052_v63 }
 0x136   :  { %v2058_v47 = vpop.permute.xlu1 %1395 }
 0x137   :  { %v1398_v33 = vunpack.i.h.bf16 %v2058_v47  ;;  %v1397_v34 = vunpack.i.l.bf16 %v2058_v47 }
 0x13a   :  { %v1386_v49 = vpop.permute.xlu0 %1385  ;;  %v854_v5 = vpop.permute.xlu1 %853 }
 0x13b   :  { %v1388_v45 = vunpack.i.h.bf16 %v1386_v49  ;;  %v1387_v9 = vunpack.i.l.bf16 %v1386_v49 }
 0x13d   :  { %v468_v36 = vsel %vm467_vm2, %v257_v46, %v1387_v9  ;;  %v887_v19 = vsel %vm467_vm2, %v677_v52, %v1388_v45  ;;  %v909_v46 = vld [vmem:[%s2146_s2] sm:$0xff]  ;;  %v911_v52 = vld [vmem:[%s2146_s2 + $0x10] sm:$0xff] }
 0x13e   :  { %v1391_v21 = vpop.permute.xlu0 %1390  ;;  %990 = vmatmul.mubr.f32.vlgmr.msra.gmra.mxu0 %v468_v36  ;;  %1000 = vmatmul.mubr.f32.vlgmr.msra.gmra.mxu1 %v887_v19  ;;  %v442_v60 = vpop.permute.xlu1 %441 }
 0x13f   :  { %v1393_v12 = vunpack.i.h.bf16 %v1391_v21  ;;  %v1392_v25 = vunpack.i.l.bf16 %v1391_v21 }
 0x141   :  { %v252_v38 = vsel %vm250_vm14, %v249_v13, %v1392_v25  ;;  %v674_v54 = vsel %vm250_vm14, %v672_v6, %v1393_v12 }
 0x142   :  { %v847_v57 = vpop.permute.xlu0 %846  ;;  %v255_v62 = vsel %vm253_vm15, %v252_v38, %v1397_v34  ;;  %v676_v27 = vsel %vm253_vm15, %v674_v54, %v1398_v33 }
 0x143   :  { %v874_v17 = vsel %vm226_vm6, %v872_v61, %v847_v57 }
 0x144   :  { %v876_v45 = vsel %vm229_vm7, %v874_v17, %v854_v5 }
 0x145   :  { %v1406_v23 = vpop.permute.xlu1 %1405 }
 0x146   :  { %v434_v7 = vpop.permute.xlu0 %433  ;;  %v1407_v2 = vunpack.i.l.bf16 %v1406_v23  ;;  %v1408_v49 = vunpack.i.h.bf16 %v1406_v23 }
 0x147   :  { %v456_v32 = vsel %vm229_vm7, %v454_v29, %v434_v7 }
 0x148   :  { %v458_v35 = vsel %vm232_vm8, %v456_v32, %v442_v60 }
 0x149   :  { %1036 = vmatprep.mubr.msk.f32.mxu0 %vm235_vm9, %v458_v35 }
 0x14a   :  { %v1401_v26 = vpop.permute.xlu0 %1400 }
 0x14b   :  { %v1403_v1 = vunpack.i.h.bf16 %v1401_v26  ;;  %v1402_v47 = vunpack.i.l.bf16 %v1401_v26 }
 0x14d   :  { %v258_v48 = vsel %vm256_vm1, %v255_v62, %v1402_v47  ;;  %v678_v11 = vsel %vm256_vm1, %v676_v27, %v1403_v1 }
 0x14e   :  { %v862_v9 = vpop.permute.xlu0 %861  ;;  %v469_v63 = vsel %vm467_vm2, %v258_v48, %v1407_v2  ;;  %v888_v42 = vsel %vm467_vm2, %v678_v11, %v1408_v49 }
 0x14f   :  { %v878_v10 = vsel %vm232_vm8, %v876_v45, %v862_v9  ;;  %995 = vmatmul.mubr.f32.gmra.mxu0 %v469_v63 }
 0x150   :  { %1038 = vmatprep.mubr.msk.f32.mxu1 %vm235_vm9, %v878_v10 }
 0x151   :  { %1005 = vmatmul.mubr.f32.gmra.mxu1 %v888_v42 }
 0x1fe   :  { %v991_v37 = vpop.f32.mrf.mxu0  ;;  %v1001_v5 = vpop.f32.mrf.mxu1 }
 0x1ff   :  { %v992_v36 = vadd.f32 %v991_v37, %v909_v46  ;;  %v1002_v19 = vadd.f32 %v1001_v5, %v911_v52 }
 0x200   :  { %v993_v18 = vpop.f32.mrf.mxu0  ;;  %v1003_v39 = vpop.f32.mrf.mxu1 }
 0x201   :  { %v1010_v21 = vmax.f32 %v992_v36, 0.0  ;;  %v1012_v40 = vmax.f32 %v1002_v19, 0.0 }
 0x203   :  { %1014 = vst [vmem:[#allocation6] sm:$0xff] %v1010_v21  ;;  %1016 = vst [vmem:[#allocation6 + $0x10] sm:$0xff] %v1012_v40 }
 0x20f   :  { %v996_v15 = vpop.f32.mrf.mxu0 }
 0x210   :  { %v997_v56 = vadd.f32 %v996_v15, %v910_v16 }
 0x211   :  { %v998_v58 = vpop.f32.mrf.mxu0  ;;  %v1006_v0 = vpop.f32.mrf.mxu1 }
 0x212   :  { %v1011_v51 = vmax.f32 %v997_v56, 0.0  ;;  %v1007_v20 = vadd.f32 %v1006_v0, %v912_v53 }
 0x213   :  { %v1008_v57 = vpop.f32.mrf.mxu1 }
 0x214   :  { %1015 = vst [vmem:[#allocation6 + $0x8] sm:$0xff] %v1011_v51  ;;  %v1013_v59 = vmax.f32 %v1007_v20, 0.0 }
 0x216   :  { %1017 = vst [vmem:[#allocation6 + $0x18] sm:$0xff] %v1013_v59 }
 0x217   :  { %1442 = shalt.err (!%p1439_p9)
}
 0x218   :  { %1029 = dma.vmem_to_hbm [thread:$0]  %s1024_s23, 512, %s2147_s3, [#allocation5], %s1456_s15, %s1456_s15, %s1457_s16  }
 0x219   :  { %1453 = dma.done.wait [#allocation5], 512  }
 0x21a   :  { %1454 = vsyncadd [#allocation5], 4294966784 }
 0x21b   :  { %1033 = vsyncpa [#allocation4], 1 }
 0x21c   :  { %1034 = vsyncpa [#allocation5], 1 }

</bundles_post_ra>
